<compile_context>
chip_gen: v7x
topology: tpu7x:2x2x1
jax: 0.10.0
libtpu: 0.0.40
codegen_flags: <defaults>
</compile_context>

<pallas_src>
import functools
import math

import jax
import jax.numpy as jnp
import numpy as np
from jax.experimental import pallas as pl
from jax.experimental.pallas import tpu as pltpu


# ----------------------------------------------------------------------------
# Shared math helpers
# ----------------------------------------------------------------------------
def _layernorm(x, gamma, beta, eps=1e-5):
    mu = jnp.mean(x, axis=-1, keepdims=True)
    var = jnp.mean((x - mu) ** 2, axis=-1, keepdims=True)
    return (x - mu) * jax.lax.rsqrt(var + eps) * gamma + beta


# ----------------------------------------------------------------------------
# Fused multi-layer transformer kernel
#   grid = (batch_blocks, num_layers); layer axis is last ("arbitrary").
#   The output block (index_map constant in the layer axis) is the resident
#   activation accumulator: initialized from x at layer 0, rewritten each
#   layer, flushed to HBM when the batch block changes.
# ----------------------------------------------------------------------------
def fused_transformer_kernel(
    x_ref,       # (TB, S, H)           f32   (read only at layer 0)
    mask_ref,    # (TB, S, 1)           f32
    wqkv_ref,    # (Lb, H, 3H)          bf16  (Q columns pre-scaled by 1/sqrt(Hd))
    wout_ref,    # (Lb, H, H)           bf16
    ln1_g_ref,   # (Lb, 1, H)           f32
    ln1_b_ref,   # (Lb, 1, H)           f32
    w1_ref,      # (Lb, H, I)           bf16
    b1_ref,      # (Lb, 1, I)           f32
    w2_ref,      # (Lb, I, H)           bf16
    b2_ref,      # (Lb, 1, H)           f32
    ln2_g_ref,   # (Lb, 1, H)           f32
    ln2_b_ref,   # (Lb, 1, H)           f32
    o_ref,       # (TB, S, H)           f32   (layer-resident activation)
    *,
    num_heads: int,
    weights_resident: bool,
):
    layer = pl.program_id(1)
    # When the full weight stack is VMEM-resident (Lb == L, constant block
    # index), index the layer dynamically; when streaming per layer, Lb == 1.
    wl = layer if weights_resident else 0

    TB, S, H = o_ref.shape
    NH = num_heads
    Hd = H // NH
    TBS = TB * S
    bf = jnp.bfloat16

    # Seed the resident activation from the input at layer 0.
    @pl.when(layer == 0)
    def _():
        o_ref[...] = x_ref[...]

    x2 = o_ref[...].reshape(TBS, H)                    # f32
    xb = x2.astype(bf)                                 # matmul operand
    mask2 = mask_ref[...].reshape(TBS, 1)              # f32

    # ---------------- AttentionBlock ----------------------------------------
    # Fused QKV projection: one (TBS,H) x (H,3H) matmul (full MXU N width).
    qkv = jnp.dot(xb, wqkv_ref[wl], preferred_element_type=jnp.float32)
    q = qkv[:, 0 * H:1 * H]                            # scale folded into weights
    k = qkv[:, 1 * H:2 * H]
    v = qkv[:, 2 * H:3 * H] * mask2                    # radial cutoff, applied once

    qb = q.astype(bf)
    kb = k.astype(bf)
    vb = v.astype(bf)

    # Per-head softmax attention (NH is small & static -> unrolled loop).
    # All score / PV matmuls use bf16 operands with f32 accumulation.
    # TODO(synk): for NH >= 8 switch to a batched head-major einsum instead of
    #             an unrolled Python loop (vreg live-range pressure).
    heads = []
    for h in range(NH):
        q3 = qb[:, h * Hd:(h + 1) * Hd].reshape(TB, S, Hd)
        k3 = kb[:, h * Hd:(h + 1) * Hd].reshape(TB, S, Hd)
        v3 = vb[:, h * Hd:(h + 1) * Hd].reshape(TB, S, Hd)

        s = jnp.einsum("bqd,bkd->bqk", q3, k3,
                       preferred_element_type=jnp.float32)     # (TB,S,S)
        s = s - jnp.max(s, axis=-1, keepdims=True)
        p = jnp.exp(s)
        p = p * pl.reciprocal(jnp.sum(p, axis=-1, keepdims=True), approx=True)

        oh = jnp.einsum("bqk,bkd->bqd", p.astype(bf), v3,
                        preferred_element_type=jnp.float32)    # (TB,S,Hd)
        heads.append(oh)

    # Assemble heads once, then ONE output projection with K = H.
    attn_cat = jnp.concatenate(heads, axis=-1).reshape(TBS, H)
    attn = jnp.dot(attn_cat.astype(bf), wout_ref[wl],
                   preferred_element_type=jnp.float32)         # (TBS,H)
    # TODO(synk): attention/output dropout omitted (eval mode -> identity).

    # ---------------- residual + LayerNorm 1 (f32) ---------------------------
    y = _layernorm(x2 + attn, ln1_g_ref[wl], ln1_b_ref[wl])

    # ---------------- Feed-forward: Linear -> SiLU -> Linear -----------------
    h1 = jnp.dot(y.astype(bf), w1_ref[wl],
                 preferred_element_type=jnp.float32) + b1_ref[wl]
    h1 = h1 * jax.nn.sigmoid(h1)                       # SiLU in f32
    ff = jnp.dot(h1.astype(bf), w2_ref[wl],
                 preferred_element_type=jnp.float32) + b2_ref[wl]

    # ---------------- residual + LayerNorm 2 (f32) ---------------------------
    z = _layernorm(y + ff, ln2_g_ref[wl], ln2_b_ref[wl])

    # Carry to next layer (VMEM-resident; flushed to HBM when the batch
    # block index changes / at kernel end).
    o_ref[...] = z.reshape(TB, S, H).astype(o_ref.dtype)


# ----------------------------------------------------------------------------
# Wrapper
# ----------------------------------------------------------------------------
def _prepare_kernel_params(p, num_heads):
    """Restructure torch-like stacked params into kernel-friendly layout."""
    L, H, _ = p["wqkv"].shape
    I = p["w1"].shape[-1]
    Hd = H // num_heads
    bf = jnp.bfloat16

    # Fold the 1/sqrt(Hd) attention scale into the Q weight columns (free).
    wqkv = p["wqkv"].astype(jnp.float32)
    wqkv = wqkv.at[:, :, :H].multiply(1.0 / math.sqrt(Hd))

    return {
        "wqkv": wqkv.astype(bf),
        "wout": p["wout"].astype(bf),
        "w1": p["w1"].astype(bf), "w2": p["w2"].astype(bf),
        "b1": p["b1"].reshape(L, 1, I).astype(jnp.float32),
        "b2": p["b2"].reshape(L, 1, H).astype(jnp.float32),
        "ln1_g": p["ln1_g"].reshape(L, 1, H).astype(jnp.float32),
        "ln1_b": p["ln1_b"].reshape(L, 1, H).astype(jnp.float32),
        "ln2_g": p["ln2_g"].reshape(L, 1, H).astype(jnp.float32),
        "ln2_b": p["ln2_b"].reshape(L, 1, H).astype(jnp.float32),
    }


def _weight_spec(shape, resident, L):
    """BlockSpec for a (L, *shape) stacked weight.

    resident=True  -> block covers the full layer axis, constant index_map
                      (DMA'd once, indexed inside the kernel).
    resident=False -> per-layer streaming along grid axis 1.
    """
    shape = tuple(shape)
    if resident:
        return pl.BlockSpec((L,) + shape, lambda b, l: (0,) * (1 + len(shape)))
    return pl.BlockSpec((1,) + shape, lambda b, l: (l,) + (0,) * len(shape))


def transformer_pallas(x, radial_mask, params, *, num_heads, batch_block=None):
    B, S, H = x.shape
    L = params["wqkv"].shape[0]
    I = params["w1"].shape[-1]
    NH = num_heads
    assert H % NH == 0

    # ------------------- chip-aware VMEM budget & batch blocking ------------
    try:
        kind = jax.devices()[0].device_kind.lower()
    except Exception:  # pragma: no cover - defensive
        kind = ""
    is_v7 = "v7" in kind
    # v7x: 64 MiB physical -> leave headroom (~48 MiB). v5e/v6e: 128 MiB -> 100 MiB.
    vmem_budget = (48 if is_v7 else 100) * 2**20

    f32b, bf16b = 4, 2
    # per-layer weight bytes (bf16 matrices + f32 biases / LN params)
    w_layer = (H * 3 * H + H * H + H * I + I * H) * bf16b + (I + 5 * H) * f32b
    w_all = L * w_layer

    def act_bytes(tb):
        tbs = tb * S
        io_blocks = 2 * 2 * tbs * H * f32b + 2 * tbs * f32b        # x/out (dbl-buf) + mask
        inter = tbs * 3 * H * f32b                                  # qkv
        inter += 3 * tbs * H * (f32b + bf16b)                       # q/k/v f32 + bf16
        inter += 2 * tb * S * S * f32b + tbs * H * f32b             # scores/probs + head outs
        inter += 2 * tbs * I * f32b + 3 * tbs * H * f32b            # FFN + y/z/attn
        return io_blocks + inter

    if batch_block is None:
        divisors = [d for d in range(B, 0, -1) if B % d == 0]
        if is_v7 and B >= 2:
            # Prefer >=2 batch blocks so the "parallel" axis feeds both TCs.
            pref = [d for d in divisors if d <= (B + 1) // 2]
            divisors = pref + [d for d in divisors if d not in pref]
        TB = 1
        for d in divisors:
            if act_bytes(d) + 2 * w_layer <= vmem_budget:
                TB = d
                break
    else:
        TB = batch_block
    assert B % TB == 0
    nb = B // TB

    # Keep the whole weight stack VMEM-resident if it fits comfortably.
    weights_resident = (2 * w_all + act_bytes(TB)) <= vmem_budget

    # ------------------- build call ------------------------------------------
    kp = _prepare_kernel_params(params, NH)
    mask3 = radial_mask.reshape(B, S, 1).astype(jnp.float32)

    kernel = functools.partial(fused_transformer_kernel,
                               num_heads=NH,
                               weights_resident=weights_resident)

    grid = (nb, L)  # batch blocks (parallel) x layers (arbitrary, innermost)

    in_specs = [
        pl.BlockSpec((TB, S, H), lambda b, l: (b, 0, 0)),     # x
        pl.BlockSpec((TB, S, 1), lambda b, l: (b, 0, 0)),     # mask
        _weight_spec((H, 3 * H), weights_resident, L),        # wqkv
        _weight_spec((H, H), weights_resident, L),            # wout
        _weight_spec((1, H), weights_resident, L),            # ln1_g
        _weight_spec((1, H), weights_resident, L),            # ln1_b
        _weight_spec((H, I), weights_resident, L),            # w1
        _weight_spec((1, I), weights_resident, L),            # b1
        _weight_spec((I, H), weights_resident, L),            # w2
        _weight_spec((1, H), weights_resident, L),            # b2
        _weight_spec((1, H), weights_resident, L),            # ln2_g
        _weight_spec((1, H), weights_resident, L),            # ln2_b
    ]

    return pl.pallas_call(
        kernel,
        out_shape=jax.ShapeDtypeStruct((B, S, H), jnp.float32),
        grid=grid,
        in_specs=in_specs,
        out_specs=pl.BlockSpec((TB, S, H), lambda b, l: (b, 0, 0)),
        compiler_params=pltpu.CompilerParams(
            dimension_semantics=("parallel", "arbitrary"),
            vmem_limit_bytes=int(vmem_budget),
        ),
    )(x.astype(jnp.float32), mask3,
      kp["wqkv"], kp["wout"], kp["ln1_g"], kp["ln1_b"],
      kp["w1"], kp["b1"], kp["w2"], kp["b2"], kp["ln2_g"], kp["ln2_b"])


# ----------------------------------------------------------------------------
# Pure-JAX f32 reference (same math as the PyTorch module, no Pallas)
# ----------------------------------------------------------------------------
def transformer_ref(x, radial_mask, p, *, num_heads):
    B, S, H = x.shape
    L = p["wqkv"].shape[0]
    Hd = H // num_heads
    for l in range(L):
        qkv = x @ p["wqkv"][l]
        q, k, v = jnp.split(qkv, 3, axis=-1)
        v = v * radial_mask[:, :, None]
        q = q.reshape(B, S, num_heads, Hd).transpose(0, 2, 1, 3)
        k = k.reshape(B, S, num_heads, Hd).transpose(0, 2, 1, 3)
        v = v.reshape(B, S, num_heads, Hd).transpose(0, 2, 1, 3)
        s = jnp.einsum("bhqd,bhkd->bhqk", q, k) / math.sqrt(Hd)
        a = jax.nn.softmax(s, axis=-1)
        o = jnp.einsum("bhqk,bhkd->bhqd", a, v).transpose(0, 2, 1, 3).reshape(B, S, H)
        attn = o @ p["wout"][l]
        y = _layernorm(x + attn, p["ln1_g"][l], p["ln1_b"][l])
        h1 = y @ p["w1"][l] + p["b1"][l]
        h1 = h1 * jax.nn.sigmoid(h1)
        ff = h1 @ p["w2"][l] + p["b2"][l]
        x = _layernorm(y + ff, p["ln2_g"][l], p["ln2_b"][l])
    return x


# ----------------------------------------------------------------------------
# Deterministic parameter init (shapes follow the PyTorch module's __init__,
# Linear weights stored pre-transposed: (in_features, out_features)),
# stacked over layers along a leading L axis.
# ----------------------------------------------------------------------------
def init_stacked_params(key, num_layers, hidden_size, intermediate_size):
    L, H, I = num_layers, hidden_size, intermediate_size
    ks = jax.random.split(key, 6)
    s_h = 1.0 / math.sqrt(H)
    s_i = 1.0 / math.sqrt(I)
    return {
        "wqkv": jax.random.normal(ks[0], (L, H, 3 * H), jnp.float32) * s_h,
        "wout": jax.random.normal(ks[1], (L, H, H), jnp.float32) * s_h,
        "w1":   jax.random.normal(ks[2], (L, H, I), jnp.float32) * s_h,
        "b1":   jax.random.normal(ks[3], (L, I), jnp.float32) * s_h,
        "w2":   jax.random.normal(ks[4], (L, I, H), jnp.float32) * s_i,
        "b2":   jax.random.normal(ks[5], (L, H), jnp.float32) * s_i,
        # LayerNorm defaults: gamma=1, beta=0
        "ln1_g": jnp.ones((L, H), jnp.float32),
        "ln1_b": jnp.zeros((L, H), jnp.float32),
        "ln2_g": jnp.ones((L, H), jnp.float32),
        "ln2_b": jnp.zeros((L, H), jnp.float32),
    }


# ----------------------------------------------------------------------------
if __name__ == "__main__":
    # Small shapes consistent with the module
    B, S, H, I, NH, L = 2, 8, 32, 64, 4, 2

    root = jax.random.PRNGKey(0)
    k_in, k_mask, k_par = jax.random.split(root, 3)

    x = jax.random.normal(k_in, (B, S, H), jnp.float32)
    # radial cutoff mask in [0, 1]
    radial_mask = jax.nn.sigmoid(jax.random.normal(k_mask, (B, S), jnp.float32))

    params = init_stacked_params(k_par, L, H, I)

    out = transformer_pallas(x, radial_mask, params, num_heads=NH)
    out = jax.block_until_ready(out)

    ref = jax.block_until_ready(
        transformer_ref(x, radial_mask, params, num_heads=NH))

    assert out.shape == (B, S, H)
    # Kernel runs bf16 matmuls (f32 accumulation) vs. a pure f32 reference;
    # 3e-2 leaves margin for bf16 rounding while catching structural errors.
    np.testing.assert_allclose(np.asarray(out), np.asarray(ref),
                               rtol=3e-2, atol=3e-2)

    print("KERNEL_OK")
</pallas_src>

<mosaic_0001>
module attributes {stable_mosaic.version = 11 : i64} {
  func.func @fused_transformer_kernel(%arg0: i32, %arg1: i32, %arg2: memref<2x8x32xf32, #tpu.memory_space<vmem>>, %arg3: memref<2x8x1xf32, #tpu.memory_space<vmem>>, %arg4: memref<2x32x96xbf16, #tpu.memory_space<vmem>>, %arg5: memref<2x32x32xbf16, #tpu.memory_space<vmem>>, %arg6: memref<2x1x32xf32, #tpu.memory_space<vmem>>, %arg7: memref<2x1x32xf32, #tpu.memory_space<vmem>>, %arg8: memref<2x32x64xbf16, #tpu.memory_space<vmem>>, %arg9: memref<2x1x64xf32, #tpu.memory_space<vmem>>, %arg10: memref<2x64x32xbf16, #tpu.memory_space<vmem>>, %arg11: memref<2x1x32xf32, #tpu.memory_space<vmem>>, %arg12: memref<2x1x32xf32, #tpu.memory_space<vmem>>, %arg13: memref<2x1x32xf32, #tpu.memory_space<vmem>>, %arg14: memref<2x8x32xf32, #tpu.memory_space<vmem>>) attributes {dimension_semantics = [#tpu.dimension_semantics<parallel>, #tpu.dimension_semantics<arbitrary>], iteration_bounds = array<i64: 1, 2>, scalar_prefetch = 0 : i64, scratch_operands = 0 : i64, tpu.core_type = #tpu.core_type<tc>, window_params = [{transform_indices = @transform_0, window_bounds = array<i64: 2, 8, 32>}, {transform_indices = @transform_1, window_bounds = array<i64: 2, 8, 1>}, {pipeline_mode = #tpu.pipeline_mode<synchronous>, transform_indices = @transform_2, window_bounds = array<i64: 2, 32, 96>}, {pipeline_mode = #tpu.pipeline_mode<synchronous>, transform_indices = @transform_3, window_bounds = array<i64: 2, 32, 32>}, {pipeline_mode = #tpu.pipeline_mode<synchronous>, transform_indices = @transform_4, window_bounds = array<i64: 2, 1, 32>}, {pipeline_mode = #tpu.pipeline_mode<synchronous>, transform_indices = @transform_5, window_bounds = array<i64: 2, 1, 32>}, {pipeline_mode = #tpu.pipeline_mode<synchronous>, transform_indices = @transform_6, window_bounds = array<i64: 2, 32, 64>}, {pipeline_mode = #tpu.pipeline_mode<synchronous>, transform_indices = @transform_7, window_bounds = array<i64: 2, 1, 64>}, {pipeline_mode = #tpu.pipeline_mode<synchronous>, transform_indices = @transform_8, window_bounds = array<i64: 2, 64, 32>}, {pipeline_mode = #tpu.pipeline_mode<synchronous>, transform_indices = @transform_9, window_bounds = array<i64: 2, 1, 32>}, {pipeline_mode = #tpu.pipeline_mode<synchronous>, transform_indices = @transform_10, window_bounds = array<i64: 2, 1, 32>}, {pipeline_mode = #tpu.pipeline_mode<synchronous>, transform_indices = @transform_11, window_bounds = array<i64: 2, 1, 32>}, {transform_indices = @transform_12, window_bounds = array<i64: 2, 8, 32>}]} {
    %c0_i32 = arith.constant 0 : i32
    %0 = arith.cmpi eq, %arg1, %c0_i32 : i32
    %1 = arith.extui %0 : i1 to i32
    %c0_i32_0 = arith.constant 0 : i32
    %2 = arith.cmpi ne, %1, %c0_i32_0 : i32
    scf.if %2 {
      %c0_59 = arith.constant 0 : index
      %c0_60 = arith.constant 0 : index
      %c0_61 = arith.constant 0 : index
      %189 = vector.load %arg2[%c0_59, %c0_60, %c0_61] : memref<2x8x32xf32, #tpu.memory_space<vmem>>, vector<2x8x32xf32>
      %c0_62 = arith.constant 0 : index
      %c0_63 = arith.constant 0 : index
      %c0_64 = arith.constant 0 : index
      %190 = vector.load %arg14[%c0_62, %c0_63, %c0_64] : memref<2x8x32xf32, #tpu.memory_space<vmem>>, vector<2x8x32xf32>
      tpu.vector_store %arg14[%c0_62, %c0_63, %c0_64], %189 {strides = array<i32>} : memref<2x8x32xf32, #tpu.memory_space<vmem>>, vector<2x8x32xf32>,
    } else {
    }
    %c0 = arith.constant 0 : index
    %c0_1 = arith.constant 0 : index
    %c0_2 = arith.constant 0 : index
    %3 = vector.load %arg14[%c0, %c0_1, %c0_2] : memref<2x8x32xf32, #tpu.memory_space<vmem>>, vector<2x8x32xf32>
    %4 = vector.shape_cast %3 : vector<2x8x32xf32> to vector<16x32xf32>
    %5 = arith.truncf %4 : vector<16x32xf32> to vector<16x32xbf16>
    %c0_3 = arith.constant 0 : index
    %c0_4 = arith.constant 0 : index
    %c0_5 = arith.constant 0 : index
    %6 = vector.load %arg3[%c0_3, %c0_4, %c0_5] : memref<2x8x1xf32, #tpu.memory_space<vmem>>, vector<2x8x1xf32>
    %7 = vector.shape_cast %6 : vector<2x8x1xf32> to vector<16x1xf32>
    %8 = arith.index_cast %arg1 : i32 to index
    %c0_6 = arith.constant 0 : index
    %c0_7 = arith.constant 0 : index
    %9 = vector.load %arg4[%8, %c0_6, %c0_7] : memref<2x32x96xbf16, #tpu.memory_space<vmem>>, vector<1x32x96xbf16>
    %10 = vector.shape_cast %9 : vector<1x32x96xbf16> to vector<32x96xbf16>
    %cst = arith.constant dense<0.000000e+00> : vector<16x96xf32>
    %11 = tpu.matmul %5, %10, %cst {dimension_numbers = #tpu.dot_dimension_numbers<[1], [0], [0], [1], [0, 0, 1, 1], [], []>} : vector<16x32xbf16>, vector<32x96xbf16>, vector<16x96xf32> -> vector<16x96xf32>
    %12 = vector.extract_strided_slice %11 {offsets = [0, 0], sizes = [16, 32], strides = [1, 1]} : vector<16x96xf32> to vector<16x32xf32>
    %13 = vector.extract_strided_slice %11 {offsets = [0, 32], sizes = [16, 32], strides = [1, 1]} : vector<16x96xf32> to vector<16x32xf32>
    %14 = vector.extract_strided_slice %11 {offsets = [0, 64], sizes = [16, 32], strides = [1, 1]} : vector<16x96xf32> to vector<16x32xf32>
    %15 = vector.broadcast %7 : vector<16x1xf32> to vector<16x32xf32>
    %16 = arith.mulf %14, %15 : vector<16x32xf32>
    %17 = arith.truncf %12 : vector<16x32xf32> to vector<16x32xbf16>
    %18 = arith.truncf %13 : vector<16x32xf32> to vector<16x32xbf16>
    %19 = arith.truncf %16 : vector<16x32xf32> to vector<16x32xbf16>
    %20 = vector.extract_strided_slice %17 {offsets = [0, 0], sizes = [16, 8], strides = [1, 1]} : vector<16x32xbf16> to vector<16x8xbf16>
    %21 = vector.shape_cast %20 : vector<16x8xbf16> to vector<2x8x8xbf16>
    %22 = vector.extract_strided_slice %18 {offsets = [0, 0], sizes = [16, 8], strides = [1, 1]} : vector<16x32xbf16> to vector<16x8xbf16>
    %23 = vector.shape_cast %22 : vector<16x8xbf16> to vector<2x8x8xbf16>
    %24 = vector.extract_strided_slice %19 {offsets = [0, 0], sizes = [16, 8], strides = [1, 1]} : vector<16x32xbf16> to vector<16x8xbf16>
    %25 = vector.shape_cast %24 : vector<16x8xbf16> to vector<2x8x8xbf16>
    "tpu.trace_start"() <{level = 10 : i32, message = "bqd,bkd->bqk"}> : () -> ()
    %cst_8 = arith.constant dense<0.000000e+00> : vector<2x8x8xf32>
    %26 = tpu.matmul %21, %23, %cst_8 {dimension_numbers = #tpu.dot_dimension_numbers<[2], [2], [1], [1], [0, 0, 0, 1, 1, 1], [0], [0]>} : vector<2x8x8xbf16>, vector<2x8x8xbf16>, vector<2x8x8xf32> -> vector<2x8x8xf32>
    "tpu.trace_stop"() : () -> ()
    %cst_9 = arith.constant dense<0xFF800000> : vector<2x8xf32>
    %27 = vector.multi_reduction <maximumf>, %26, %cst_9 [2] : vector<2x8x8xf32> to vector<2x8xf32>
    %28 = vector.shape_cast %27 : vector<2x8xf32> to vector<2x8x1xf32>
    %29 = vector.broadcast %28 : vector<2x8x1xf32> to vector<2x8x8xf32>
    %30 = arith.subf %26, %29 : vector<2x8x8xf32>
    %31 = math.exp %30 : vector<2x8x8xf32>
    %cst_10 = arith.constant dense<0.000000e+00> : vector<2x8xf32>
    %32 = vector.multi_reduction <add>, %31, %cst_10 [2] : vector<2x8x8xf32> to vector<2x8xf32>
    %33 = vector.shape_cast %32 : vector<2x8xf32> to vector<2x8x1xf32>
    %34 = tpu.reciprocal %33 {approx = true} : vector<2x8x1xf32> -> vector<2x8x1xf32>
    %35 = vector.broadcast %34 : vector<2x8x1xf32> to vector<2x8x8xf32>
    %36 = arith.mulf %31, %35 : vector<2x8x8xf32>
    %37 = arith.truncf %36 : vector<2x8x8xf32> to vector<2x8x8xbf16>
    "tpu.trace_start"() <{level = 10 : i32, message = "bqk,bkd->bqd"}> : () -> ()
    %cst_11 = arith.constant dense<0.000000e+00> : vector<2x8x8xf32>
    %38 = tpu.matmul %37, %25, %cst_11 {dimension_numbers = #tpu.dot_dimension_numbers<[2], [1], [1], [2], [0, 0, 0, 1, 1, 2], [0], [0]>} : vector<2x8x8xbf16>, vector<2x8x8xbf16>, vector<2x8x8xf32> -> vector<2x8x8xf32>
    "tpu.trace_stop"() : () -> ()
    %39 = vector.extract_strided_slice %17 {offsets = [0, 8], sizes = [16, 8], strides = [1, 1]} : vector<16x32xbf16> to vector<16x8xbf16>
    %40 = vector.shape_cast %39 : vector<16x8xbf16> to vector<2x8x8xbf16>
    %41 = vector.extract_strided_slice %18 {offsets = [0, 8], sizes = [16, 8], strides = [1, 1]} : vector<16x32xbf16> to vector<16x8xbf16>
    %42 = vector.shape_cast %41 : vector<16x8xbf16> to vector<2x8x8xbf16>
    %43 = vector.extract_strided_slice %19 {offsets = [0, 8], sizes = [16, 8], strides = [1, 1]} : vector<16x32xbf16> to vector<16x8xbf16>
    %44 = vector.shape_cast %43 : vector<16x8xbf16> to vector<2x8x8xbf16>
    "tpu.trace_start"() <{level = 10 : i32, message = "bqd,bkd->bqk"}> : () -> ()
    %cst_12 = arith.constant dense<0.000000e+00> : vector<2x8x8xf32>
    %45 = tpu.matmul %40, %42, %cst_12 {dimension_numbers = #tpu.dot_dimension_numbers<[2], [2], [1], [1], [0, 0, 0, 1, 1, 1], [0], [0]>} : vector<2x8x8xbf16>, vector<2x8x8xbf16>, vector<2x8x8xf32> -> vector<2x8x8xf32>
    "tpu.trace_stop"() : () -> ()
    %cst_13 = arith.constant dense<0xFF800000> : vector<2x8xf32>
    %46 = vector.multi_reduction <maximumf>, %45, %cst_13 [2] : vector<2x8x8xf32> to vector<2x8xf32>
    %47 = vector.shape_cast %46 : vector<2x8xf32> to vector<2x8x1xf32>
    %48 = vector.broadcast %47 : vector<2x8x1xf32> to vector<2x8x8xf32>
    %49 = arith.subf %45, %48 : vector<2x8x8xf32>
    %50 = math.exp %49 : vector<2x8x8xf32>
    %cst_14 = arith.constant dense<0.000000e+00> : vector<2x8xf32>
    %51 = vector.multi_reduction <add>, %50, %cst_14 [2] : vector<2x8x8xf32> to vector<2x8xf32>
    %52 = vector.shape_cast %51 : vector<2x8xf32> to vector<2x8x1xf32>
    %53 = tpu.reciprocal %52 {approx = true} : vector<2x8x1xf32> -> vector<2x8x1xf32>
    %54 = vector.broadcast %53 : vector<2x8x1xf32> to vector<2x8x8xf32>
    %55 = arith.mulf %50, %54 : vector<2x8x8xf32>
    %56 = arith.truncf %55 : vector<2x8x8xf32> to vector<2x8x8xbf16>
    "tpu.trace_start"() <{level = 10 : i32, message = "bqk,bkd->bqd"}> : () -> ()
    %cst_15 = arith.constant dense<0.000000e+00> : vector<2x8x8xf32>
    %57 = tpu.matmul %56, %44, %cst_15 {dimension_numbers = #tpu.dot_dimension_numbers<[2], [1], [1], [2], [0, 0, 0, 1, 1, 2], [0], [0]>} : vector<2x8x8xbf16>, vector<2x8x8xbf16>, vector<2x8x8xf32> -> vector<2x8x8xf32>
    "tpu.trace_stop"() : () -> ()
    %58 = vector.extract_strided_slice %17 {offsets = [0, 16], sizes = [16, 8], strides = [1, 1]} : vector<16x32xbf16> to vector<16x8xbf16>
    %59 = vector.shape_cast %58 : vector<16x8xbf16> to vector<2x8x8xbf16>
    %60 = vector.extract_strided_slice %18 {offsets = [0, 16], sizes = [16, 8], strides = [1, 1]} : vector<16x32xbf16> to vector<16x8xbf16>
    %61 = vector.shape_cast %60 : vector<16x8xbf16> to vector<2x8x8xbf16>
    %62 = vector.extract_strided_slice %19 {offsets = [0, 16], sizes = [16, 8], strides = [1, 1]} : vector<16x32xbf16> to vector<16x8xbf16>
    %63 = vector.shape_cast %62 : vector<16x8xbf16> to vector<2x8x8xbf16>
    "tpu.trace_start"() <{level = 10 : i32, message = "bqd,bkd->bqk"}> : () -> ()
    %cst_16 = arith.constant dense<0.000000e+00> : vector<2x8x8xf32>
    %64 = tpu.matmul %59, %61, %cst_16 {dimension_numbers = #tpu.dot_dimension_numbers<[2], [2], [1], [1], [0, 0, 0, 1, 1, 1], [0], [0]>} : vector<2x8x8xbf16>, vector<2x8x8xbf16>, vector<2x8x8xf32> -> vector<2x8x8xf32>
    "tpu.trace_stop"() : () -> ()
    %cst_17 = arith.constant dense<0xFF800000> : vector<2x8xf32>
    %65 = vector.multi_reduction <maximumf>, %64, %cst_17 [2] : vector<2x8x8xf32> to vector<2x8xf32>
    %66 = vector.shape_cast %65 : vector<2x8xf32> to vector<2x8x1xf32>
    %67 = vector.broadcast %66 : vector<2x8x1xf32> to vector<2x8x8xf32>
    %68 = arith.subf %64, %67 : vector<2x8x8xf32>
    %69 = math.exp %68 : vector<2x8x8xf32>
    %cst_18 = arith.constant dense<0.000000e+00> : vector<2x8xf32>
    %70 = vector.multi_reduction <add>, %69, %cst_18 [2] : vector<2x8x8xf32> to vector<2x8xf32>
    %71 = vector.shape_cast %70 : vector<2x8xf32> to vector<2x8x1xf32>
    %72 = tpu.reciprocal %71 {approx = true} : vector<2x8x1xf32> -> vector<2x8x1xf32>
    %73 = vector.broadcast %72 : vector<2x8x1xf32> to vector<2x8x8xf32>
    %74 = arith.mulf %69, %73 : vector<2x8x8xf32>
    %75 = arith.truncf %74 : vector<2x8x8xf32> to vector<2x8x8xbf16>
    "tpu.trace_start"() <{level = 10 : i32, message = "bqk,bkd->bqd"}> : () -> ()
    %cst_19 = arith.constant dense<0.000000e+00> : vector<2x8x8xf32>
    %76 = tpu.matmul %75, %63, %cst_19 {dimension_numbers = #tpu.dot_dimension_numbers<[2], [1], [1], [2], [0, 0, 0, 1, 1, 2], [0], [0]>} : vector<2x8x8xbf16>, vector<2x8x8xbf16>, vector<2x8x8xf32> -> vector<2x8x8xf32>
    "tpu.trace_stop"() : () -> ()
    %77 = vector.extract_strided_slice %17 {offsets = [0, 24], sizes = [16, 8], strides = [1, 1]} : vector<16x32xbf16> to vector<16x8xbf16>
    %78 = vector.shape_cast %77 : vector<16x8xbf16> to vector<2x8x8xbf16>
    %79 = vector.extract_strided_slice %18 {offsets = [0, 24], sizes = [16, 8], strides = [1, 1]} : vector<16x32xbf16> to vector<16x8xbf16>
    %80 = vector.shape_cast %79 : vector<16x8xbf16> to vector<2x8x8xbf16>
    %81 = vector.extract_strided_slice %19 {offsets = [0, 24], sizes = [16, 8], strides = [1, 1]} : vector<16x32xbf16> to vector<16x8xbf16>
    %82 = vector.shape_cast %81 : vector<16x8xbf16> to vector<2x8x8xbf16>
    "tpu.trace_start"() <{level = 10 : i32, message = "bqd,bkd->bqk"}> : () -> ()
    %cst_20 = arith.constant dense<0.000000e+00> : vector<2x8x8xf32>
    %83 = tpu.matmul %78, %80, %cst_20 {dimension_numbers = #tpu.dot_dimension_numbers<[2], [2], [1], [1], [0, 0, 0, 1, 1, 1], [0], [0]>} : vector<2x8x8xbf16>, vector<2x8x8xbf16>, vector<2x8x8xf32> -> vector<2x8x8xf32>
    "tpu.trace_stop"() : () -> ()
    %cst_21 = arith.constant dense<0xFF800000> : vector<2x8xf32>
    %84 = vector.multi_reduction <maximumf>, %83, %cst_21 [2] : vector<2x8x8xf32> to vector<2x8xf32>
    %85 = vector.shape_cast %84 : vector<2x8xf32> to vector<2x8x1xf32>
    %86 = vector.broadcast %85 : vector<2x8x1xf32> to vector<2x8x8xf32>
    %87 = arith.subf %83, %86 : vector<2x8x8xf32>
    %88 = math.exp %87 : vector<2x8x8xf32>
    %cst_22 = arith.constant dense<0.000000e+00> : vector<2x8xf32>
    %89 = vector.multi_reduction <add>, %88, %cst_22 [2] : vector<2x8x8xf32> to vector<2x8xf32>
    %90 = vector.shape_cast %89 : vector<2x8xf32> to vector<2x8x1xf32>
    %91 = tpu.reciprocal %90 {approx = true} : vector<2x8x1xf32> -> vector<2x8x1xf32>
    %92 = vector.broadcast %91 : vector<2x8x1xf32> to vector<2x8x8xf32>
    %93 = arith.mulf %88, %92 : vector<2x8x8xf32>
    %94 = arith.truncf %93 : vector<2x8x8xf32> to vector<2x8x8xbf16>
    "tpu.trace_start"() <{level = 10 : i32, message = "bqk,bkd->bqd"}> : () -> ()
    %cst_23 = arith.constant dense<0.000000e+00> : vector<2x8x8xf32>
    %95 = tpu.matmul %94, %82, %cst_23 {dimension_numbers = #tpu.dot_dimension_numbers<[2], [1], [1], [2], [0, 0, 0, 1, 1, 2], [0], [0]>} : vector<2x8x8xbf16>, vector<2x8x8xbf16>, vector<2x8x8xf32> -> vector<2x8x8xf32>
    "tpu.trace_stop"() : () -> ()
    %96 = tpu.concatenate %38, %57, %76, %95 in 2 : vector<2x8x8xf32>, vector<2x8x8xf32>, vector<2x8x8xf32>, vector<2x8x8xf32> -> vector<2x8x32xf32>
    %97 = vector.shape_cast %96 : vector<2x8x32xf32> to vector<16x32xf32>
    %98 = arith.truncf %97 : vector<16x32xf32> to vector<16x32xbf16>
    %99 = arith.index_cast %arg1 : i32 to index
    %c0_24 = arith.constant 0 : index
    %c0_25 = arith.constant 0 : index
    %100 = vector.load %arg5[%99, %c0_24, %c0_25] : memref<2x32x32xbf16, #tpu.memory_space<vmem>>, vector<1x32x32xbf16>
    %101 = vector.shape_cast %100 : vector<1x32x32xbf16> to vector<32x32xbf16>
    %cst_26 = arith.constant dense<0.000000e+00> : vector<16x32xf32>
    %102 = tpu.matmul %98, %101, %cst_26 {dimension_numbers = #tpu.dot_dimension_numbers<[1], [0], [0], [1], [0, 0, 1, 1], [], []>} : vector<16x32xbf16>, vector<32x32xbf16>, vector<16x32xf32> -> vector<16x32xf32>
    %103 = arith.addf %4, %102 : vector<16x32xf32>
    %104 = arith.index_cast %arg1 : i32 to index
    %c0_27 = arith.constant 0 : index
    %c0_28 = arith.constant 0 : index
    %105 = vector.load %arg6[%104, %c0_27, %c0_28] : memref<2x1x32xf32, #tpu.memory_space<vmem>>, vector<1x1x32xf32>
    %106 = vector.shape_cast %105 : vector<1x1x32xf32> to vector<1x32xf32>
    %107 = arith.index_cast %arg1 : i32 to index
    %c0_29 = arith.constant 0 : index
    %c0_30 = arith.constant 0 : index
    %108 = vector.load %arg7[%107, %c0_29, %c0_30] : memref<2x1x32xf32, #tpu.memory_space<vmem>>, vector<1x1x32xf32>
    %109 = vector.shape_cast %108 : vector<1x1x32xf32> to vector<1x32xf32>
    %cst_31 = arith.constant dense<0.000000e+00> : vector<16xf32>
    %110 = vector.multi_reduction <add>, %103, %cst_31 [1] : vector<16x32xf32> to vector<16xf32>
    %111 = vector.shape_cast %110 : vector<16xf32> to vector<16x1xf32>
    %cst_32 = arith.constant 3.200000e+01 : f32
    %112 = vector.broadcast %cst_32 : f32 to vector<16x1xf32>
    %113 = arith.divf %111, %112 : vector<16x1xf32>
    %114 = vector.broadcast %113 : vector<16x1xf32> to vector<16x32xf32>
    %115 = arith.subf %103, %114 : vector<16x32xf32>
    %116 = arith.mulf %115, %115 : vector<16x32xf32>
    %cst_33 = arith.constant dense<0.000000e+00> : vector<16xf32>
    %117 = vector.multi_reduction <add>, %116, %cst_33 [1] : vector<16x32xf32> to vector<16xf32>
    %118 = vector.shape_cast %117 : vector<16xf32> to vector<16x1xf32>
    %cst_34 = arith.constant 3.200000e+01 : f32
    %119 = vector.broadcast %cst_34 : f32 to vector<16x1xf32>
    %120 = arith.divf %118, %119 : vector<16x1xf32>
    %121 = vector.broadcast %113 : vector<16x1xf32> to vector<16x32xf32>
    %122 = arith.subf %103, %121 : vector<16x32xf32>
    %cst_35 = arith.constant 9.99999974E-6 : f32
    %123 = vector.broadcast %cst_35 : f32 to vector<16x1xf32>
    %124 = arith.addf %120, %123 : vector<16x1xf32>
    %125 = math.rsqrt %124 : vector<16x1xf32>
    %126 = vector.broadcast %125 : vector<16x1xf32> to vector<16x32xf32>
    %127 = arith.mulf %122, %126 : vector<16x32xf32>
    %128 = vector.broadcast %106 : vector<1x32xf32> to vector<16x32xf32>
    %129 = arith.mulf %127, %128 : vector<16x32xf32>
    %130 = vector.broadcast %109 : vector<1x32xf32> to vector<16x32xf32>
    %131 = arith.addf %129, %130 : vector<16x32xf32>
    %132 = arith.truncf %131 : vector<16x32xf32> to vector<16x32xbf16>
    %133 = arith.index_cast %arg1 : i32 to index
    %c0_36 = arith.constant 0 : index
    %c0_37 = arith.constant 0 : index
    %134 = vector.load %arg8[%133, %c0_36, %c0_37] : memref<2x32x64xbf16, #tpu.memory_space<vmem>>, vector<1x32x64xbf16>
    %135 = vector.shape_cast %134 : vector<1x32x64xbf16> to vector<32x64xbf16>
    %cst_38 = arith.constant dense<0.000000e+00> : vector<16x64xf32>
    %136 = tpu.matmul %132, %135, %cst_38 {dimension_numbers = #tpu.dot_dimension_numbers<[1], [0], [0], [1], [0, 0, 1, 1], [], []>} : vector<16x32xbf16>, vector<32x64xbf16>, vector<16x64xf32> -> vector<16x64xf32>
    %137 = arith.index_cast %arg1 : i32 to index
    %c0_39 = arith.constant 0 : index
    %c0_40 = arith.constant 0 : index
    %138 = vector.load %arg9[%137, %c0_39, %c0_40] : memref<2x1x64xf32, #tpu.memory_space<vmem>>, vector<1x1x64xf32>
    %139 = vector.shape_cast %138 : vector<1x1x64xf32> to vector<1x64xf32>
    %140 = vector.broadcast %139 : vector<1x64xf32> to vector<16x64xf32>
    %141 = arith.addf %136, %140 : vector<16x64xf32>
    %142 = arith.negf %141 : vector<16x64xf32>
    %143 = math.exp %142 : vector<16x64xf32>
    %cst_41 = arith.constant 1.000000e+00 : f32
    %144 = vector.broadcast %cst_41 : f32 to vector<16x64xf32>
    %145 = arith.addf %144, %143 : vector<16x64xf32>
    %146 = arith.divf %144, %145 : vector<16x64xf32>
    %147 = arith.mulf %141, %146 : vector<16x64xf32>
    %148 = arith.truncf %147 : vector<16x64xf32> to vector<16x64xbf16>
    %149 = arith.index_cast %arg1 : i32 to index
    %c0_42 = arith.constant 0 : index
    %c0_43 = arith.constant 0 : index
    %150 = vector.load %arg10[%149, %c0_42, %c0_43] : memref<2x64x32xbf16, #tpu.memory_space<vmem>>, vector<1x64x32xbf16>
    %151 = vector.shape_cast %150 : vector<1x64x32xbf16> to vector<64x32xbf16>
    %cst_44 = arith.constant dense<0.000000e+00> : vector<16x32xf32>
    %152 = tpu.matmul %148, %151, %cst_44 {dimension_numbers = #tpu.dot_dimension_numbers<[1], [0], [0], [1], [0, 0, 1, 1], [], []>} : vector<16x64xbf16>, vector<64x32xbf16>, vector<16x32xf32> -> vector<16x32xf32>
    %153 = arith.index_cast %arg1 : i32 to index
    %c0_45 = arith.constant 0 : index
    %c0_46 = arith.constant 0 : index
    %154 = vector.load %arg11[%153, %c0_45, %c0_46] : memref<2x1x32xf32, #tpu.memory_space<vmem>>, vector<1x1x32xf32>
    %155 = vector.shape_cast %154 : vector<1x1x32xf32> to vector<1x32xf32>
    %156 = vector.broadcast %155 : vector<1x32xf32> to vector<16x32xf32>
    %157 = arith.addf %152, %156 : vector<16x32xf32>
    %158 = arith.addf %131, %157 : vector<16x32xf32>
    %159 = arith.index_cast %arg1 : i32 to index
    %c0_47 = arith.constant 0 : index
    %c0_48 = arith.constant 0 : index
    %160 = vector.load %arg12[%159, %c0_47, %c0_48] : memref<2x1x32xf32, #tpu.memory_space<vmem>>, vector<1x1x32xf32>
    %161 = vector.shape_cast %160 : vector<1x1x32xf32> to vector<1x32xf32>
    %162 = arith.index_cast %arg1 : i32 to index
    %c0_49 = arith.constant 0 : index
    %c0_50 = arith.constant 0 : index
    %163 = vector.load %arg13[%162, %c0_49, %c0_50] : memref<2x1x32xf32, #tpu.memory_space<vmem>>, vector<1x1x32xf32>
    %164 = vector.shape_cast %163 : vector<1x1x32xf32> to vector<1x32xf32>
    %cst_51 = arith.constant dense<0.000000e+00> : vector<16xf32>
    %165 = vector.multi_reduction <add>, %158, %cst_51 [1] : vector<16x32xf32> to vector<16xf32>
    %166 = vector.shape_cast %165 : vector<16xf32> to vector<16x1xf32>
    %cst_52 = arith.constant 3.200000e+01 : f32
    %167 = vector.broadcast %cst_52 : f32 to vector<16x1xf32>
    %168 = arith.divf %166, %167 : vector<16x1xf32>
    %169 = vector.broadcast %168 : vector<16x1xf32> to vector<16x32xf32>
    %170 = arith.subf %158, %169 : vector<16x32xf32>
    %171 = arith.mulf %170, %170 : vector<16x32xf32>
    %cst_53 = arith.constant dense<0.000000e+00> : vector<16xf32>
    %172 = vector.multi_reduction <add>, %171, %cst_53 [1] : vector<16x32xf32> to vector<16xf32>
    %173 = vector.shape_cast %172 : vector<16xf32> to vector<16x1xf32>
    %cst_54 = arith.constant 3.200000e+01 : f32
    %174 = vector.broadcast %cst_54 : f32 to vector<16x1xf32>
    %175 = arith.divf %173, %174 : vector<16x1xf32>
    %176 = vector.broadcast %168 : vector<16x1xf32> to vector<16x32xf32>
    %177 = arith.subf %158, %176 : vector<16x32xf32>
    %cst_55 = arith.constant 9.99999974E-6 : f32
    %178 = vector.broadcast %cst_55 : f32 to vector<16x1xf32>
    %179 = arith.addf %175, %178 : vector<16x1xf32>
    %180 = math.rsqrt %179 : vector<16x1xf32>
    %181 = vector.broadcast %180 : vector<16x1xf32> to vector<16x32xf32>
    %182 = arith.mulf %177, %181 : vector<16x32xf32>
    %183 = vector.broadcast %161 : vector<1x32xf32> to vector<16x32xf32>
    %184 = arith.mulf %182, %183 : vector<16x32xf32>
    %185 = vector.broadcast %164 : vector<1x32xf32> to vector<16x32xf32>
    %186 = arith.addf %184, %185 : vector<16x32xf32>
    %187 = vector.shape_cast %186 : vector<16x32xf32> to vector<2x8x32xf32>
    %c0_56 = arith.constant 0 : index
    %c0_57 = arith.constant 0 : index
    %c0_58 = arith.constant 0 : index
    %188 = vector.load %arg14[%c0_56, %c0_57, %c0_58] : memref<2x8x32xf32, #tpu.memory_space<vmem>>, vector<2x8x32xf32>
    tpu.vector_store %arg14[%c0_56, %c0_57, %c0_58], %187 {strides = array<i32>} : memref<2x8x32xf32, #tpu.memory_space<vmem>>, vector<2x8x32xf32>,
    return
  }
  func.func @transform_0(%arg0: i32, %arg1: i32) -> (i32, i32, i32) {
    %c0_i32 = arith.constant 0 : i32
    %c0_i32_0 = arith.constant 0 : i32
    %c0_i32_1 = arith.constant 0 : i32
    return %arg0, %c0_i32, %c0_i32_0 : i32, i32, i32
  }
  func.func @transform_1(%arg0: i32, %arg1: i32) -> (i32, i32, i32) {
    %c0_i32 = arith.constant 0 : i32
    %c0_i32_0 = arith.constant 0 : i32
    %c0_i32_1 = arith.constant 0 : i32
    return %arg0, %c0_i32, %c0_i32_0 : i32, i32, i32
  }
  func.func @transform_2(%arg0: i32, %arg1: i32) -> (i32, i32, i32) {
    %c0_i32 = arith.constant 0 : i32
    %c0_i32_0 = arith.constant 0 : i32
    %c0_i32_1 = arith.constant 0 : i32
    %c0_i32_2 = arith.constant 0 : i32
    return %c0_i32, %c0_i32_0, %c0_i32_1 : i32, i32, i32
  }
  func.func @transform_3(%arg0: i32, %arg1: i32) -> (i32, i32, i32) {
    %c0_i32 = arith.constant 0 : i32
    %c0_i32_0 = arith.constant 0 : i32
    %c0_i32_1 = arith.constant 0 : i32
    %c0_i32_2 = arith.constant 0 : i32
    return %c0_i32, %c0_i32_0, %c0_i32_1 : i32, i32, i32
  }
  func.func @transform_4(%arg0: i32, %arg1: i32) -> (i32, i32, i32) {
    %c0_i32 = arith.constant 0 : i32
    %c0_i32_0 = arith.constant 0 : i32
    %c0_i32_1 = arith.constant 0 : i32
    %c0_i32_2 = arith.constant 0 : i32
    return %c0_i32, %c0_i32_0, %c0_i32_1 : i32, i32, i32
  }
  func.func @transform_5(%arg0: i32, %arg1: i32) -> (i32, i32, i32) {
    %c0_i32 = arith.constant 0 : i32
    %c0_i32_0 = arith.constant 0 : i32
    %c0_i32_1 = arith.constant 0 : i32
    %c0_i32_2 = arith.constant 0 : i32
    return %c0_i32, %c0_i32_0, %c0_i32_1 : i32, i32, i32
  }
  func.func @transform_6(%arg0: i32, %arg1: i32) -> (i32, i32, i32) {
    %c0_i32 = arith.constant 0 : i32
    %c0_i32_0 = arith.constant 0 : i32
    %c0_i32_1 = arith.constant 0 : i32
    %c0_i32_2 = arith.constant 0 : i32
    return %c0_i32, %c0_i32_0, %c0_i32_1 : i32, i32, i32
  }
  func.func @transform_7(%arg0: i32, %arg1: i32) -> (i32, i32, i32) {
    %c0_i32 = arith.constant 0 : i32
    %c0_i32_0 = arith.constant 0 : i32
    %c0_i32_1 = arith.constant 0 : i32
    %c0_i32_2 = arith.constant 0 : i32
    return %c0_i32, %c0_i32_0, %c0_i32_1 : i32, i32, i32
  }
  func.func @transform_8(%arg0: i32, %arg1: i32) -> (i32, i32, i32) {
    %c0_i32 = arith.constant 0 : i32
    %c0_i32_0 = arith.constant 0 : i32
    %c0_i32_1 = arith.constant 0 : i32
    %c0_i32_2 = arith.constant 0 : i32
    return %c0_i32, %c0_i32_0, %c0_i32_1 : i32, i32, i32
  }
  func.func @transform_9(%arg0: i32, %arg1: i32) -> (i32, i32, i32) {
    %c0_i32 = arith.constant 0 : i32
    %c0_i32_0 = arith.constant 0 : i32
    %c0_i32_1 = arith.constant 0 : i32
    %c0_i32_2 = arith.constant 0 : i32
    return %c0_i32, %c0_i32_0, %c0_i32_1 : i32, i32, i32
  }
  func.func @transform_10(%arg0: i32, %arg1: i32) -> (i32, i32, i32) {
    %c0_i32 = arith.constant 0 : i32
    %c0_i32_0 = arith.constant 0 : i32
    %c0_i32_1 = arith.constant 0 : i32
    %c0_i32_2 = arith.constant 0 : i32
    return %c0_i32, %c0_i32_0, %c0_i32_1 : i32, i32, i32
  }
  func.func @transform_11(%arg0: i32, %arg1: i32) -> (i32, i32, i32) {
    %c0_i32 = arith.constant 0 : i32
    %c0_i32_0 = arith.constant 0 : i32
    %c0_i32_1 = arith.constant 0 : i32
    %c0_i32_2 = arith.constant 0 : i32
    return %c0_i32, %c0_i32_0, %c0_i32_1 : i32, i32, i32
  }
  func.func @transform_12(%arg0: i32, %arg1: i32) -> (i32, i32, i32) {
    %c0_i32 = arith.constant 0 : i32
    %c0_i32_0 = arith.constant 0 : i32
    %c0_i32_1 = arith.constant 0 : i32
    return %arg0, %c0_i32, %c0_i32_0 : i32, i32, i32
  }
}

</mosaic_0001>

<bundles_post_ra>
// kernel: tpu_custom_call.1
= control target key start
LH: loop header
LB: loop body
LE: loop exit
PB: predicated region body
PF: predicated region fallthrough
CT: control target
= control target key end

     0   :  { %s3743_s0 = inlined_call_operand.hbm [shape: f32[2,8,32], index: 0, kind: input, shape index: {}]   ;;  %s3744_s1 = inlined_call_operand.hbm [shape: f32[2,8,1], index: 1, kind: input, shape index: {}]   ;;  %s3745_s2 = inlined_call_operand.hbm [shape: bf16[2,32,96], index: 2, kind: input, shape index: {}]   ;;  %s3746_s3 = inlined_call_operand.hbm [shape: bf16[2,32,32], index: 3, kind: input, shape index: {}]   ;;  %s3747_s4 = inlined_call_operand.hbm [shape: f32[2,1,32], index: 4, kind: input, shape index: {}]   ;;  %s3748_s5 = inlined_call_operand.hbm [shape: f32[2,1,32], index: 5, kind: input, shape index: {}]   ;;  %s3749_s6 = inlined_call_operand.hbm [shape: bf16[2,32,64], index: 6, kind: input, shape index: {}]   ;;  %s3750_s7 = inlined_call_operand.hbm [shape: f32[2,1,64], index: 7, kind: input, shape index: {}]   ;;  %s3751_s8 = inlined_call_operand.hbm [shape: bf16[2,64,32], index: 8, kind: input, shape index: {}]   ;;  %s3752_s9 = inlined_call_operand.hbm [shape: f32[2,1,32], index: 9, kind: input, shape index: {}]   ;;  %s3753_s10 = inlined_call_operand.hbm [shape: f32[2,1,32], index: 10, kind: input, shape index: {}]   ;;  %s3754_s11 = inlined_call_operand.hbm [shape: f32[2,1,32], index: 11, kind: input, shape index: {}]   ;;  %s3755_s12 = inlined_call_operand.hbm [shape: f32[2,8,32], index: 12, kind: output, shape index: {}]  }
   0x1   :  { %3775 = sst [smem:[#allocation34_spill]] %s3743_s0 }
   0x2   :  { %3776 = sst [smem:[#allocation35_spill]] %s3744_s1 }
   0x3   :  { %3777 = sst [smem:[#allocation36_spill]] %s3745_s2 }
   0x4   :  { %3778 = sst [smem:[#allocation37_spill]] %s3755_s12 }
   0x5   :  { %17 = vsyncpa [#allocation3], 0 }
   0x6   :  { %18 = vsyncpa [#allocation6], 0 }
   0x7   :  { %19 = vsyncpa [#allocation9], 0 }
   0x8   :  { %20 = vsyncpa [#allocation12], 0 }
   0x9   :  { %21 = vsyncpa [#allocation15], 0 }
   0xa   :  { %22 = vsyncpa [#allocation18], 0 }
   0xb   :  { %23 = vsyncpa [#allocation21], 0 }
   0xc   :  { %24 = vsyncpa [#allocation4], 0  ;;  %s3162_s21 = smov 0   ;;  %s3164_s22 = smov 0  }
   0xd   :  { %s3166_s23 = smov 0  }
   0xe LB: > { %3779 = sst [smem:[#allocation31_spill]] %s3050_s21  ;;  %s3759_s24 = sadd.s32 4294967295, %s3058_s23   ;;  %s3058_s23 = sphi %s3166_s23, %s30_s23   ;;  %s3054_s22 = sphi %s3164_s22, %s3806_s22   ;;  %s3050_s21 = sphi %s3162_s21, %s3805_s21  }
   0xf   : > { %3780 = sst [smem:[#allocation32_spill]] %s3058_s23  ;;  %p2126_p0 = scmp.ge.s32.totalorder %s3058_s23, 1 }
  0x10   : > { %p335_p1 = scmp.lt.s32.totalorder %s3058_s23, 3  ;;  %p3182_p2 = scmp.eq.s32.totalorder %s3759_s24, 0 }
  0x11   : > { %s3060_s27 = smov [#allocation5]   ;;  %s3061_s30 = smov [#allocation8]  }
  0x12   : > { %s3781_s25 = scalar_select %p3182_p2, 1, 0 }
  0x13   : > { %p3186_p3 = pnand %p2126_p0, %p335_p1  ;;  %s366_s28 = sshll.u32 %s3060_s27, 4  ;;  %s367_s28 = int_to_ptr.vmem [resolvable:$true] %s366_s28 }
  0x14   : > { %3782 = sst [smem:[#allocation33_spill]] %s3781_s25  ;;  %s392_s13 = sshll.u32 %s3061_s30, 4  ;;  %s3198_s13 = int_to_ptr.vmem [resolvable:$true] %s392_s13 }
  0x15   : > { %s3783_s26 = scalar_select %p3186_p3, 1, 0 }
  0x16   : > { %p2443_p4 = pneg %p3186_p3  ;;  %s3785_s1 = sld [smem:[#allocation35_spill]] }
  0x18   : > { %p3194_p5 = pnand %p3182_p2, %p2443_p4 }
  0x1a   : > { %p3208_p7 = pneg %p3194_p5 }
  0x1c   : > { %s2642_s16 = scalar_lea.hbm %s3785_s1, 256 }
  0x1d   : > { %p2643_p6 = scmp.ne.s32.totalorder %s3785_s1, %s2642_s16  ;;  %p2649_p10 = scmp.lt.u32.totalorder %s2642_s16, %s3785_s1 }
  0x1f   : > { %p2645_p8 = pnand %p3208_p7, %p2643_p6 }
  0x21   : > { %p2646_p9 = pneg %p2645_p8 }
  0x23   : > { %p2651_p11 = pnand %p2649_p10, %p2646_p9 }
  0x25   : > { %2654 = shalt.err (!%p2651_p11)
}
  0x26   : > { %s2655_s30 = scalar_lea.vmem %s367_s28, 256  ;;  %p2663_p1 = scmp.lt.s32.totalorder %s367_s28, %s367_s28 }
  0x27   : > { %p2656_p12 = scmp.ne.s32.totalorder %s367_s28, %s2655_s30  ;;  %p2664_p4 = scmp.lt.s32.totalorder %s2655_s30, %s2655_s30 }
  0x29   : > { %p2658_p13 = pnand %p2656_p12, %p3208_p7  ;;  %p2665_p2 = por %p2664_p4, %p2663_p1 }
  0x2b   : > { %p2659_p0 = pneg %p2658_p13 }
  0x2d   : > { %p2666_p3 = pnand %p2665_p2, %p2659_p0 }
  0x2f   : > { %2669 = shalt.err (!%p2666_p3)
}
  0x30   : > { %s3762_s14 = smov 128   ;;  %s3763_s15 = smov 8  }
  0x31   : > { %2449 = dma.hbm_to_vmem [thread:$0]  (!%p3194_p5), %s3785_s1, 256, %s367_s28, [#allocation6], %s3762_s14, %s3762_s14, %s3763_s15  }
  0x32   : > { %s2670_s27 = scalar_lea.hbm %s3746_s3, 512 }
  0x33   : > { %p2671_p2 = scmp.ne.s32.totalorder %s3746_s3, %s2670_s27  ;;  %p2677_p8 = scmp.lt.u32.totalorder %s2670_s27, %s3746_s3 }
  0x35   : > { %p2673_p3 = pnand %p2671_p2, %p3208_p7 }
  0x37   : > { %p2674_p6 = pneg %p2673_p3 }
  0x39   : > { %p2679_p9 = pnand %p2677_p8, %p2674_p6 }
  0x3b   : > { %2682 = shalt.err (!%p2679_p9)
}
  0x3c   : > { %s2683_s28 = scalar_lea.vmem %s3198_s13, 512  ;;  %p2691_p13 = scmp.lt.s32.totalorder %s3198_s13, %s3198_s13 }
  0x3d   : > { %p2684_p10 = scmp.ne.s32.totalorder %s3198_s13, %s2683_s28  ;;  %p2692_p0 = scmp.lt.s32.totalorder %s2683_s28, %s2683_s28 }
  0x3f   : > { %p2686_p11 = pnand %p2684_p10, %p3208_p7  ;;  %p2693_p1 = por %p2692_p0, %p2691_p13 }
  0x41   : > { %p2687_p12 = pneg %p2686_p11 }
  0x43   : > { %p2694_p4 = pnand %p2693_p1, %p2687_p12 }
  0x45   : > { %2697 = shalt.err (!%p2694_p4)
}
  0x46   : > { %s3771_s24 = smov 64   ;;  %s3773_s12 = smov 4  }
  0x47   : > { %2455 = dma.hbm_to_vmem [thread:$0]  (!%p3194_p5), %s3746_s3, 512, %s3198_s13, [#allocation9], %s3771_s24, %s3771_s24, %s3773_s12  }
  0x48   : > { %s3066_s17 = smov [#allocation11]   ;;  %s3067_s20 = smov [#allocation14]  }
  0x49   : > { %s418_s18 = sshll.u32 %s3066_s17, 4  ;;  %s444_s27 = sshll.u32 %s3067_s20, 4  ;;  %s419_s18 = int_to_ptr.vmem [resolvable:$true] %s418_s18  ;;  %s445_s27 = int_to_ptr.vmem [resolvable:$true] %s444_s27 }
  0x4a   : > { %s2698_s14 = scalar_lea.hbm %s3748_s5, 32 }
  0x4b   : > { %p2699_p2 = scmp.ne.s32.totalorder %s3748_s5, %s2698_s14  ;;  %p2705_p8 = scmp.lt.u32.totalorder %s2698_s14, %s3748_s5 }
  0x4d   : > { %p2701_p3 = pnand %p2699_p2, %p3208_p7 }
  0x4f   : > { %p2702_p6 = pneg %p2701_p3 }
  0x51   : > { %p2707_p9 = pnand %p2705_p8, %p2702_p6 }
  0x53   : > { %2710 = shalt.err (!%p2707_p9)
}
  0x54   : > { %s2711_s13 = scalar_lea.vmem %s419_s18, 32  ;;  %p2719_p13 = scmp.lt.s32.totalorder %s419_s18, %s419_s18 }
  0x55   : > { %p2712_p10 = scmp.ne.s32.totalorder %s419_s18, %s2711_s13  ;;  %p2720_p0 = scmp.lt.s32.totalorder %s2711_s13, %s2711_s13 }
  0x57   : > { %p2714_p11 = pnand %p2712_p10, %p3208_p7  ;;  %p2721_p1 = por %p2720_p0, %p2719_p13 }
  0x59   : > { %p2715_p12 = pneg %p2714_p11 }
  0x5b   : > { %p2722_p4 = pnand %p2721_p1, %p2715_p12 }
  0x5d   : > { %2725 = shalt.err (!%p2722_p4)
}
  0x5e   : > { %s3767_s1 = smov 16   ;;  %s3769_s15 = smov 1  }
  0x5f   : > { %2461 = dma.hbm_to_vmem [thread:$0]  (!%p3194_p5), %s3748_s5, 32, %s419_s18, [#allocation12], %s3767_s1, %s3767_s1, %s3769_s15  }
  0x60   : > { %s2726_s16 = scalar_lea.hbm %s3750_s7, 32 }
  0x61   : > { %p2727_p2 = scmp.ne.s32.totalorder %s3750_s7, %s2726_s16  ;;  %p2733_p8 = scmp.lt.u32.totalorder %s2726_s16, %s3750_s7 }
  0x63   : > { %p2729_p3 = pnand %p2727_p2, %p3208_p7 }
  0x65   : > { %p2730_p6 = pneg %p2729_p3 }
  0x67   : > { %p2735_p9 = pnand %p2733_p8, %p2730_p6 }
  0x69   : > { %2738 = shalt.err (!%p2735_p9)
}
  0x6a   : > { %s2739_s13 = scalar_lea.vmem %s445_s27, 32  ;;  %p2747_p13 = scmp.lt.s32.totalorder %s445_s27, %s445_s27 }
  0x6b   : > { %p2740_p10 = scmp.ne.s32.totalorder %s445_s27, %s2739_s13  ;;  %p2748_p0 = scmp.lt.s32.totalorder %s2739_s13, %s2739_s13 }
  0x6d   : > { %p2742_p11 = pnand %p2740_p10, %p3208_p7  ;;  %p2749_p1 = por %p2748_p0, %p2747_p13 }
  0x6f   : > { %p2743_p12 = pneg %p2742_p11 }
  0x71   : > { %p2750_p4 = pnand %p2749_p1, %p2743_p12 }
  0x73   : > { %2753 = shalt.err (!%p2750_p4)
}
  0x74   : > { %2467 = dma.hbm_to_vmem [thread:$0]  (!%p3194_p5), %s3750_s7, 32, %s445_s27, [#allocation15], %s3767_s1, %s3767_s1, %s3769_s15  }
  0x75   : > { %s3070_s25 = smov [#allocation17]   ;;  %s2754_s17 = scalar_lea.hbm %s3752_s9, 32 }
  0x76   : > { %s470_s14 = sshll.u32 %s3070_s25, 4  ;;  %p2755_p2 = scmp.ne.s32.totalorder %s3752_s9, %s2754_s17  ;;  %s471_s14 = int_to_ptr.vmem [resolvable:$true] %s470_s14 }
  0x77   : > { %p2761_p8 = scmp.lt.u32.totalorder %s2754_s17, %s3752_s9 }
  0x78   : > { %p2757_p3 = pnand %p2755_p2, %p3208_p7 }
  0x7a   : > { %p2758_p6 = pneg %p2757_p3 }
  0x7c   : > { %p2763_p9 = pnand %p2761_p8, %p2758_p6 }
  0x7e   : > { %2766 = shalt.err (!%p2763_p9)
}
  0x7f   : > { %s2767_s27 = scalar_lea.vmem %s471_s14, 32  ;;  %p2775_p13 = scmp.lt.s32.totalorder %s471_s14, %s471_s14 }
  0x80   : > { %p2768_p10 = scmp.ne.s32.totalorder %s471_s14, %s2767_s27  ;;  %p2776_p0 = scmp.lt.s32.totalorder %s2767_s27, %s2767_s27 }
  0x82   : > { %p2770_p11 = pnand %p2768_p10, %p3208_p7  ;;  %p2777_p1 = por %p2776_p0, %p2775_p13 }
  0x84   : > { %p2771_p12 = pneg %p2770_p11 }
  0x86   : > { %p2778_p4 = pnand %p2777_p1, %p2771_p12 }
  0x88   : > { %2781 = shalt.err (!%p2778_p4)
}
  0x89   : > { %2473 = dma.hbm_to_vmem [thread:$0]  (!%p3194_p5), %s3752_s9, 32, %s471_s14, [#allocation18], %s3767_s1, %s3767_s1, %s3769_s15  }
  0x8a   : > { %s39_s25 = sadd.s32 1, %s3054_s22  ;;  %s3071_s23 = smov [#allocation2]  }
  0x8b   : > { %p40_p2 = scmp.ge.s32.totalorder %s39_s25, 2  ;;  %s350_s16 = sshll.u32 %s3071_s23, 4  ;;  %s351_s16 = int_to_ptr.vmem [resolvable:$true] %s350_s16 }
  0x8c   : > { %s3787_s0 = sld [smem:[#allocation34_spill]] }
  0x8d   : > { %s3808_s25 = smov (%p40_p2, %s39_s25), 0 }
  0x92   : > { %s2782_s30 = scalar_lea.hbm %s3787_s0, 256 }
  0x93   : > { %p2783_p3 = scmp.ne.s32.totalorder %s3787_s0, %s2782_s30  ;;  %p2789_p9 = scmp.lt.u32.totalorder %s2782_s30, %s3787_s0 }
  0x95   : > { %p2785_p6 = pnand %p2783_p3, %p3208_p7 }
  0x97   : > { %p2786_p8 = pneg %p2785_p6 }
  0x99   : > { %p2791_p10 = pnand %p2789_p9, %p2786_p8 }
  0x9b   : > { %2794 = shalt.err (!%p2791_p10)
}
  0x9c   : > { %s2795_s18 = scalar_lea.vmem %s351_s16, 256  ;;  %p2803_p0 = scmp.lt.s32.totalorder %s351_s16, %s351_s16 }
  0x9d   : > { %p2796_p11 = scmp.ne.s32.totalorder %s351_s16, %s2795_s18  ;;  %p2804_p1 = scmp.lt.s32.totalorder %s2795_s18, %s2795_s18 }
  0x9f   : > { %p2798_p12 = pnand %p2796_p11, %p3208_p7  ;;  %p2805_p4 = por %p2804_p1, %p2803_p0 }
  0xa1   : > { %p2799_p13 = pneg %p2798_p12 }
  0xa3   : > { %p2806_p2 = pnand %p2805_p4, %p2799_p13 }
  0xa5   : > { %2809 = shalt.err (!%p2806_p2)
}
  0xa6   : > { %s3788_s21 = smov 8   ;;  %s3789_s23 = smov 128  }
  0xa7   : > { %2446 = dma.hbm_to_vmem [thread:$0]  (!%p3194_p5), %s3787_s0, 256, %s351_s16, [#allocation3], %s3789_s23, %s3789_s23, %s3788_s21  }
  0xa8   : > { %s3072_s30 = smov [#allocation7]   ;;  %s3073_s13 = smov [#allocation10]  }
  0xa9   : > { %s379_s28 = sshll.u32 %s3072_s30, 4  ;;  %s405_s27 = sshll.u32 %s3073_s13, 4  ;;  %s380_s28 = int_to_ptr.vmem [resolvable:$true] %s379_s28  ;;  %s406_s27 = int_to_ptr.vmem [resolvable:$true] %s405_s27 }
  0xaa   : > { %s3790_s2 = sld [smem:[#allocation36_spill]] }
  0xb0   : > { %s2810_s1 = scalar_lea.hbm %s3790_s2, 512 }
  0xb1   : > { %p2811_p3 = scmp.ne.s32.totalorder %s3790_s2, %s2810_s1  ;;  %p2817_p9 = scmp.lt.u32.totalorder %s2810_s1, %s3790_s2 }
  0xb3   : > { %p2813_p6 = pnand %p2811_p3, %p3208_p7 }
  0xb5   : > { %p2814_p8 = pneg %p2813_p6 }
  0xb7   : > { %p2819_p10 = pnand %p2817_p9, %p2814_p8 }
  0xb9   : > { %2822 = shalt.err (!%p2819_p10)
}
  0xba   : > { %s2823_s16 = scalar_lea.vmem %s380_s28, 512  ;;  %p2831_p0 = scmp.lt.s32.totalorder %s380_s28, %s380_s28 }
  0xbb   : > { %p2824_p11 = scmp.ne.s32.totalorder %s380_s28, %s2823_s16  ;;  %p2832_p1 = scmp.lt.s32.totalorder %s2823_s16, %s2823_s16 }
  0xbd   : > { %p2826_p12 = pnand %p2824_p11, %p3208_p7  ;;  %p2833_p4 = por %p2832_p1, %p2831_p0 }
  0xbf   : > { %p2827_p13 = pneg %p2826_p12 }
  0xc1   : > { %p2834_p2 = pnand %p2833_p4, %p2827_p13 }
  0xc3   : > { %2837 = shalt.err (!%p2834_p2)
}
  0xc4   : > { %s3791_s24 = smov 4   ;;  %s3792_s15 = smov 64  }
  0xc5   : > { %2452 = dma.hbm_to_vmem [thread:$0]  (!%p3194_p5), %s3790_s2, 512, %s380_s28, [#allocation6], %s3792_s15, %s3792_s15, %s3791_s24  }
  0xc6   : > { %s2838_s20 = scalar_lea.hbm %s3747_s4, 32 }
  0xc7   : > { %p2839_p3 = scmp.ne.s32.totalorder %s3747_s4, %s2838_s20  ;;  %p2845_p9 = scmp.lt.u32.totalorder %s2838_s20, %s3747_s4 }
  0xc9   : > { %p2841_p6 = pnand %p2839_p3, %p3208_p7 }
  0xcb   : > { %p2842_p8 = pneg %p2841_p6 }
  0xcd   : > { %p2847_p10 = pnand %p2845_p9, %p2842_p8 }
  0xcf   : > { %2850 = shalt.err (!%p2847_p10)
}
  0xd0   : > { %s2851_s17 = scalar_lea.vmem %s406_s27, 32  ;;  %p2859_p0 = scmp.lt.s32.totalorder %s406_s27, %s406_s27 }
  0xd1   : > { %p2852_p11 = scmp.ne.s32.totalorder %s406_s27, %s2851_s17  ;;  %p2860_p1 = scmp.lt.s32.totalorder %s2851_s17, %s2851_s17 }
  0xd3   : > { %p2854_p12 = pnand %p2852_p11, %p3208_p7  ;;  %p2861_p4 = por %p2860_p1, %p2859_p0 }
  0xd5   : > { %p2855_p13 = pneg %p2854_p12 }
  0xd7   : > { %p2862_p2 = pnand %p2861_p4, %p2855_p13 }
  0xd9   : > { %2865 = shalt.err (!%p2862_p2)
}
  0xda   : > { %s3793_s28 = smov 1   ;;  %s3794_s16 = smov 16  }
  0xdb   : > { %2458 = dma.hbm_to_vmem [thread:$0]  (!%p3194_p5), %s3747_s4, 32, %s406_s27, [#allocation9], %s3794_s16, %s3794_s16, %s3793_s28  }
  0xdc   : > { %s3074_s21 = smov [#allocation13]   ;;  %s3075_s20 = smov [#allocation16]  }
  0xdd   : > { %s431_s23 = sshll.u32 %s3074_s21, 4  ;;  %s457_s30 = sshll.u32 %s3075_s20, 4  ;;  %s432_s23 = int_to_ptr.vmem [resolvable:$true] %s431_s23  ;;  %s458_s30 = int_to_ptr.vmem [resolvable:$true] %s457_s30 }
  0xde   : > { %s2866_s18 = scalar_lea.hbm %s3749_s6, 512 }
  0xdf   : > { %p2867_p3 = scmp.ne.s32.totalorder %s3749_s6, %s2866_s18  ;;  %p2873_p9 = scmp.lt.u32.totalorder %s2866_s18, %s3749_s6 }
  0xe1   : > { %p2869_p6 = pnand %p2867_p3, %p3208_p7 }
  0xe3   : > { %p2870_p8 = pneg %p2869_p6 }
  0xe5   : > { %p2875_p10 = pnand %p2873_p9, %p2870_p8 }
  0xe7   : > { %2878 = shalt.err (!%p2875_p10)
}
  0xe8   : > { %s2879_s27 = scalar_lea.vmem %s432_s23, 512  ;;  %p2887_p0 = scmp.lt.s32.totalorder %s432_s23, %s432_s23 }
  0xe9   : > { %p2880_p11 = scmp.ne.s32.totalorder %s432_s23, %s2879_s27  ;;  %p2888_p1 = scmp.lt.s32.totalorder %s2879_s27, %s2879_s27 }
  0xeb   : > { %p2882_p12 = pnand %p2880_p11, %p3208_p7  ;;  %p2889_p4 = por %p2888_p1, %p2887_p0 }
  0xed   : > { %p2883_p13 = pneg %p2882_p12 }
  0xef   : > { %p2890_p2 = pnand %p2889_p4, %p2883_p13 }
  0xf1   : > { %2893 = shalt.err (!%p2890_p2)
}
  0xf2   : > { %2464 = dma.hbm_to_vmem [thread:$0]  (!%p3194_p5), %s3749_s6, 512, %s432_s23, [#allocation12], %s3792_s15, %s3792_s15, %s3791_s24  }
  0xf3   : > { %s2894_s20 = scalar_lea.hbm %s3751_s8, 1024 }
  0xf4   : > { %p2895_p3 = scmp.ne.s32.totalorder %s3751_s8, %s2894_s20  ;;  %p2901_p9 = scmp.lt.u32.totalorder %s2894_s20, %s3751_s8 }
  0xf6   : > { %p2897_p6 = pnand %p2895_p3, %p3208_p7 }
  0xf8   : > { %p2898_p8 = pneg %p2897_p6 }
  0xfa   : > { %p2903_p10 = pnand %p2901_p9, %p2898_p8 }
  0xfc   : > { %2906 = shalt.err (!%p2903_p10)
}
  0xfd   : > { %s2907_s12 = scalar_lea.vmem %s458_s30, 1024  ;;  %p2915_p0 = scmp.lt.s32.totalorder %s458_s30, %s458_s30 }
  0xfe   : > { %p2908_p11 = scmp.ne.s32.totalorder %s458_s30, %s2907_s12  ;;  %p2916_p1 = scmp.lt.s32.totalorder %s2907_s12, %s2907_s12 }
 0x100   : > { %p2910_p12 = pnand %p2908_p11, %p3208_p7  ;;  %p2917_p4 = por %p2916_p1, %p2915_p0 }
 0x102   : > { %p2911_p13 = pneg %p2910_p12 }
 0x104   : > { %p2918_p2 = pnand %p2917_p4, %p2911_p13 }
 0x106   : > { %2921 = shalt.err (!%p2918_p2)
}
 0x107   : > { %2470 = dma.hbm_to_vmem [thread:$0]  (!%p3194_p5), %s3751_s8, 1024, %s458_s30, [#allocation15], %s3792_s15, %s3792_s15, %s3791_s24  }
 0x108   : > { %s3076_s0 = smov [#allocation19]   ;;  %s3077_s1 = smov [#allocation20]  }
 0x109   : > { %s483_s2 = sshll.u32 %s3076_s0, 4  ;;  %s496_s21 = sshll.u32 %s3077_s1, 4  ;;  %s484_s2 = int_to_ptr.vmem [resolvable:$true] %s483_s2  ;;  %s497_s21 = int_to_ptr.vmem [resolvable:$true] %s496_s21 }
 0x10a   : > { %s2922_s14 = scalar_lea.hbm %s3753_s10, 32 }
 0x10b   : > { %p2923_p3 = scmp.ne.s32.totalorder %s3753_s10, %s2922_s14  ;;  %p2929_p9 = scmp.lt.u32.totalorder %s2922_s14, %s3753_s10 }
 0x10d   : > { %p2925_p6 = pnand %p2923_p3, %p3208_p7 }
 0x10f   : > { %p2926_p8 = pneg %p2925_p6 }
 0x111   : > { %p2931_p10 = pnand %p2929_p9, %p2926_p8 }
 0x113   : > { %2934 = shalt.err (!%p2931_p10)
}
 0x114   : > { %s2935_s24 = scalar_lea.vmem %s484_s2, 32  ;;  %p2943_p0 = scmp.lt.s32.totalorder %s484_s2, %s484_s2 }
 0x115   : > { %p2936_p11 = scmp.ne.s32.totalorder %s484_s2, %s2935_s24  ;;  %p2944_p1 = scmp.lt.s32.totalorder %s2935_s24, %s2935_s24 }
 0x117   : > { %p2938_p12 = pnand %p2936_p11, %p3208_p7  ;;  %p2945_p4 = por %p2944_p1, %p2943_p0 }
 0x119   : > { %p2939_p13 = pneg %p2938_p12 }
 0x11b   : > { %p2946_p2 = pnand %p2945_p4, %p2939_p13 }
 0x11d   : > { %2949 = shalt.err (!%p2946_p2)
}
 0x11e   : > { %2476 = dma.hbm_to_vmem [thread:$0]  (!%p3194_p5), %s3753_s10, 32, %s484_s2, [#allocation18], %s3794_s16, %s3794_s16, %s3793_s28  }
 0x11f   : > { %s2950_s1 = scalar_lea.hbm %s3754_s11, 32 }
 0x120   : > { %p2951_p3 = scmp.ne.s32.totalorder %s3754_s11, %s2950_s1  ;;  %p2957_p9 = scmp.lt.u32.totalorder %s2950_s1, %s3754_s11 }
 0x122   : > { %p2953_p6 = pnand %p2951_p3, %p3208_p7 }
 0x124   : > { %p2954_p8 = pneg %p2953_p6 }
 0x126   : > { %p2959_p10 = pnand %p2957_p9, %p2954_p8 }
 0x128   : > { %2962 = shalt.err (!%p2959_p10)
}
 0x129   : > { %s2963_s17 = scalar_lea.vmem %s497_s21, 32  ;;  %p2971_p0 = scmp.lt.s32.totalorder %s497_s21, %s497_s21 }
 0x12a   : > { %p2964_p11 = scmp.ne.s32.totalorder %s497_s21, %s2963_s17  ;;  %p2972_p1 = scmp.lt.s32.totalorder %s2963_s17, %s2963_s17 }
 0x12c   : > { %p2966_p12 = pnand %p2964_p11, %p3208_p7  ;;  %p2973_p4 = por %p2972_p1, %p2971_p0 }
 0x12e   : > { %p2967_p13 = pneg %p2966_p12 }
 0x130   : > { %p2974_p2 = pnand %p2973_p4, %p2967_p13 }
 0x132   : > { %2977 = shalt.err (!%p2974_p2)
}
 0x133   : > { %2479 = dma.hbm_to_vmem [thread:$0]  (!%p3194_p5), %s3754_s11, 32, %s497_s21, [#allocation21], %s3794_s16, %s3794_s16, %s3793_s28  }
 0x134   : > { %p3795_p3 = scmp.ne.s32.totalorder %s3783_s26, 0 }
 0x135   : > { %s3796_s19 = sld [smem:[#allocation33_spill]] (!%p3795_p3) }
 0x136   : > { %512 = sbr.rel (%p3795_p3) target bundleno = 4502 (0x1196), region = 68 }
 0x13b   : > { %p3797_p7 = scmp.ne.s32.totalorder (!%p3795_p3), %s3796_s19, 0 }
 0x13d   : > { %3017 = dma.done.wait (%p3797_p7), [#allocation3], 256  }
 0x13e   : > { %3019 = vsyncadd (%p3797_p7), [#allocation3], 4294967040 }
 0x13f   : > { %3021 = dma.done.wait (%p3797_p7), [#allocation6], 768  }
 0x140   : > { %3023 = vsyncadd (%p3797_p7), [#allocation6], 4294966528 }
 0x141   : > { %3025 = dma.done.wait (%p3797_p7), [#allocation9], 544  }
 0x142   : > { %3027 = vsyncadd (%p3797_p7), [#allocation9], 4294966752 }
 0x143   : > { %3029 = dma.done.wait (%p3797_p7), [#allocation12], 544  }
 0x144   : > { %3031 = vsyncadd (%p3797_p7), [#allocation12], 4294966752 }
 0x145   : > { %3033 = dma.done.wait (%p3797_p7), [#allocation15], 1056  }
 0x146   : > { %3035 = vsyncadd (%p3797_p7), [#allocation15], 4294966240 }
 0x147   : > { %3037 = dma.done.wait (%p3797_p7), [#allocation18], 64  }
 0x148   : > { %3039 = vsyncadd (%p3797_p7), [#allocation18], 4294967232 }
 0x149   : > { %3041 = dma.done.wait (%p3797_p7), [#allocation21], 32  }
 0x14a   : > { %3043 = vsyncadd (%p3797_p7), [#allocation21], 4294967264  ;;  %s3798_s26 = sld [smem:[#allocation31_spill]] }
 0x150   : > { %p2152_p5 = scmp.ne.s32.totalorder %s3798_s26, 0 }
 0x151   : > { %v596_v0 = vld [vmem:[#allocation2] sm:$0xff] (!%p2152_p5)  ;;  %vm598_vm0 = vcmask (!%p2152_p5), 261120   ;;  %v597_v1 = vld [vmem:[#allocation2 + $0x8] sm:$0xff] (!%p2152_p5) }
 0x152   : > { %595 = sbr.rel (%p2152_p5) target bundleno = 345 (0x159), region = 120  ;;  %599 = vst.msk [vmem:[#allocation22] sm:$0xff] (!%p2152_p5), %vm598_vm0, %v596_v0  ;;  %600 = vst.msk [vmem:[#allocation22 + $0x8] sm:$0xff] (!%p2152_p5), %vm598_vm0, %v597_v1 }
 0x159 PF: > { %s3799_s29 = sld [smem:[#allocation31_spill]]  ;;  %v3078_v2 = vmov 0.0   ;;  %vm3079_vm1 = vmmov 0   ;;  %v3504_v4 = vld [vmem:[#allocation22] sm:$0xff]  ;;  %v3506_v5 = vld [vmem:[#allocation22 + $0x8] sm:$0xff]  ;;  %vm625_vm2 = vcmask 261120  }
 0x15a   : > { %2259 = vmatprep.subr.bf16.mxu0 %v3078_v2  ;;  %2263 = vmatprep.mubr.msk.bf16.mxu0 %vm3079_vm1, %v3078_v2  ;;  %v603_v7 = vpack.c.bf16 %v3506_v5, %v3504_v4  ;;  %v3080_v8 = vmov 0   ;;  %s3081_s24 = smov 96   ;;  %v604_v15 = vld [vmem:[#allocation5] sm:$0xff]  ;;  %vm694_vm3 = vcmask 64512   ;;  %s3082_s15 = smov 64   ;;  %vm819_vm4 = vcmask 1043456  }
 0x15b   : > { %2267 = vmatprep.subr.bf16.mxu1 %v3078_v2  ;;  %2269 = vmatprep.mubr.msk.bf16.mxu1 %vm3079_vm1, %v3078_v2  ;;  %v605_v35 = vld [vmem:[#allocation5 + $0x8] sm:$0xff]  ;;  %s3083_s30 = smov 88   ;;  %s3084_s27 = smov 120   ;;  %vm1598_vm5 = vcmask 130048   ;;  %vm1601_vm6 = vcmask 195584   ;;  %vm1845_vm7 = vcmask 523264  }
 0x15c   : > { %2567 = vset.pattern.permute.xlu0 %v3080_v8  ;;  %2568 = vset.pattern.permute.xlu1 %v3080_v8  ;;  %s3085_s0 = smov 56   ;;  %s3086_s1 = smov 80  }
 0x15d   : > { %s3087_s20 = smov 112   ;;  %s3088_s13 = smov 48  }
 0x15e   : > { %s3089_s14 = smov 72   ;;  %s3090_s18 = smov 104  }
 0x15f   : > { %s3498_s28 = sshll.u32 %s3799_s29, 4  ;;  %s3091_s17 = smov 40  }
 0x160   : > { %s608_s16 = scalar_lea.vmem [#allocation7], %s3498_s28  ;;  %s1606_s21 = scalar_lea.vmem [#allocation8], %s3498_s28 }
 0x161   : > { %v2584_v3 = vld [vmem:[%s608_s16] sm:$0xff]   ;;  %v2585_v6 = vld [vmem:[%s608_s16 + $0x8] sm:$0xff]   ;;  %s1718_s23 = scalar_lea.vmem [#allocation13], %s3498_s28  ;;  %s3092_s2 = smov 8  }
 0x162   : > { %2260 = vmatpush3.bf16.msra.mxu0 %v2584_v3  ;;  %s3093_s12 = smov 16   ;;  %s3094_s19 = smov 24  }
 0x163   : > { %2261 = vmatprep.subr.bf16.mxu0 %v3078_v2  ;;  %s1669_s26 = scalar_lea.vmem [#allocation10], %s3799_s29  ;;  %s1671_s28 = scalar_lea.vmem [#allocation11], %s3799_s29 }
 0x164   : > { %s2212_s16 = sshll.u32 %s3799_s29, 5 }
 0x166   : > { %2262 = vmatpush3.bf16.msra.mxu0 %v2585_v6 }
 0x167   : > { %2273 = vmatprep.subr.bf16.mxu0 %v3078_v2 }
 0x169   : > { %2264 = vmatmul.mubr.msk.bf16.vlgmr.msra.gmra.mrb[0].mxu0 %vm625_vm2, %v603_v7 }
 0x16a   : > { %2275 = vmatprep.mubr.msk.bf16.mxu0 %vm3079_vm1, %v3078_v2 }
 0x23c   : > { %v663_v9 = vpop.f32.mrb[0].mxu0 }
 0x23d   : > { %v3520_v10 = vpack.c.bf16 %v663_v9, %v663_v9  ;;  %v2265_v11 = vpop.f32.mrb[1].mxu0 }
 0x23e   : > { %v666_v12 = vpop.f32.mrb[2].mxu0 }
 0x23f   : > { %692 = vrot.lane.b32.xlu0 %v3520_v10, %s3081_s24  ;;  %v2266_v13 = vpop.f32.mrb[3].mxu0  ;;  %v3523_v14 = vpack.c.bf16 %v666_v12, %v666_v12 }
 0x243   : > { %741 = vrot.lane.b32.xlu0 %v3523_v14, %s3081_s24  ;;  %s1813_s24 = scalar_lea.vmem [#allocation17], %s3799_s29 }
 0x247   : > { %672 = vperm.xlu0 %2567, %v604_v15  }
 0x2b1   : > { %v693_v16 = vpop.permute.xlu0 %692 }
 0x2b2   : > { %v699_v17 = vsel %vm694_vm3, %v693_v16, 0 }
 0x2b3   : > { %2268 = vmatpush3.bf16.xpose.msra.mxu1 %v699_v17 }
 0x2b4   : > { %2279 = vmatprep.subr.bf16.mxu1 %v3078_v2 }
 0x2b5   : > { %v742_v18 = vpop.permute.xlu0 %741 }
 0x2b6   : > { %v747_v19 = vsel %vm694_vm3, %v742_v18, 0 }
 0x2b7   : > { %2274 = vmatpush3.bf16.xpose.msra.mxu0 %v747_v19 }
 0x2b8   : > { %2285 = vmatprep.subr.bf16.mxu0 %v3078_v2 }
 0x2ba   : > { %2270 = vmatmul.mubr.msk.bf16.vlgmr.msra.gmra.mrb[0].mxu1 %vm694_vm3, %v3520_v10 }
 0x2bb   : > { %2281 = vmatprep.mubr.msk.bf16.mxu1 %vm3079_vm1, %v3078_v2 }
 0x2be   : > { %2276 = vmatmul.mubr.msk.bf16.vlgmr.msra.gmra.mrb[4].mxu0 %vm694_vm3, %v3523_v14 }
 0x2bf   : > { %2287 = vmatprep.mubr.msk.bf16.mxu0 %vm3079_vm1, %v3078_v2 }
 0x2c6   : > { %v673_v20 = vpop.permute.xlu0 %672 }
 0x2c7   : > { %v680_v21 = vmul.f32 %v673_v20, %v663_v9 }
 0x2c9   : > { %v3538_v22 = vpack.c.bf16 %v680_v21, %v680_v21 }
 0x2cb   : > { %814 = vrot.lane.b32.xlu0 %v3538_v22, %s3082_s15 }
 0x33d   : > { %v815_v23 = vpop.permute.xlu0 %814 }
 0x33e   : > { %v821_v24 = vsel %vm819_vm4, %v815_v23, 0 }
 0x33f   : > { %2280 = vmatpush3.bf16.msra.mxu1 %v821_v24 }
 0x340   : > { %2291 = vmatprep.subr.bf16.mxu1 %v3078_v2 }
 0x38d   : > { %v735_v25 = vpop.f32.mrb[0].mxu1 }
 0x38e   : > { %v2271_v26 = vpop.f32.mrb[1].mxu1  ;;  %v789_v27 = vsel %vm694_vm3, %v735_v25, -inf }
 0x38f   : > { %790 = vmax.xlane.f32.xlu1 %v789_v27  ;;  %v738_v28 = vpop.f32.mrb[2].mxu1 }
 0x390   : > { %v2272_v29 = vpop.f32.mrb[3].mxu1 }
 0x391   : > { %v783_v30 = vpop.f32.mrb[4].mxu0 }
 0x392   : > { %v2277_v31 = vpop.f32.mrb[5].mxu0  ;;  %v792_v32 = vsel %vm694_vm3, %v783_v30, -inf }
 0x393   : > { %793 = vmax.xlane.f32.xlu1 %v792_v32  ;;  %v786_v33 = vpop.f32.mrb[6].mxu0 }
 0x394   : > { %v2278_v34 = vpop.f32.mrb[7].mxu0 }
 0x3a4   : > { %677 = vperm.xlu1 %2568, %v605_v35  }
 0x41c   : > { %v791_v36 = vpop.xlane.xlu1 %790 }
 0x41d   : > { %v795_v37 = vsub.f32 %v735_v25, %v791_v36 }
 0x41f   : > { %v797_v38 = vmul.f32 1.442695, %v795_v37 }
 0x420   : > { %v794_v39 = vpop.xlane.xlu1 %793 }
 0x421   : > { %2594 = vpow2.f32 %v797_v38  ;;  %v796_v40 = vsub.f32 %v783_v30, %v794_v39 }
 0x423   : > { %v799_v41 = vmul.f32 1.442695, %v796_v40 }
 0x424   : > { %v678_v46 = vpop.permute.xlu1 %677 }
 0x425   : > { %2596 = vpow2.f32 %v799_v41  ;;  %v681_v47 = vmul.f32 %v678_v46, %v666_v12 }
 0x427   : > { %v3548_v48 = vpack.c.bf16 %v681_v47, %v681_v47 }
 0x42b   : > { %v2595_v42 = vpop.eup %2594 }
 0x42c   : > { %v801_v43 = vsel %vm694_vm3, %v2595_v42, 0.0 }
 0x42d   : > { %802 = vadd.xlane.f32.xlu0 %v801_v43 }
 0x42f   : > { %v2597_v44 = vpop.eup %2596 }
 0x430   : > { %v804_v45 = vsel %vm694_vm3, %v2597_v44, 0.0 }
 0x431   : > { %805 = vadd.xlane.f32.xlu1 %v804_v45 }
 0x442   : > { %864 = vrot.lane.b32.xlu1 %v3548_v48, %s3082_s15  ;;  %s3800_s15 = sld [smem:[#allocation32_spill]] }
 0x443   : > { %914 = vrot.lane.b32.xlu0 %v3520_v10, %s3083_s30 }
 0x446   : > { %962 = vrot.lane.b32.xlu1 %v3523_v14, %s3084_s27 }
 0x447   : > { %964 = vrot.lane.b32.xlu0 %v3523_v14, %s3083_s30  ;;  %s1892_s30 = scalar_lea.vmem [#allocation19], %s3799_s29 }
 0x44b   : > { %912 = vrot.lane.b32.xlu0 %v3520_v10, %s3084_s27  ;;  %s1894_s27 = scalar_lea.vmem [#allocation20], %s3799_s29 }
 0x4ba   : > { %v803_v49 = vpop.xlane.xlu0 %802 }
 0x4bb   : > { %2598 = vrcp.f32 %v803_v49 }
 0x4be   : > { %v806_v50 = vpop.xlane.xlu1 %805  ;;  %v915_v54 = vpop.permute.xlu0 %914 }
 0x4bf   : > { %2600 = vrcp.f32 %v806_v50  ;;  %v920_v58 = vsel %vm694_vm3, %v915_v54, 0 }
 0x4c2   : > { %v865_v51 = vpop.permute.xlu1 %864  ;;  %v965_v60 = vpop.permute.xlu0 %964 }
 0x4c3   : > { %v870_v52 = vsel %vm819_vm4, %v865_v51, 0  ;;  %v970_v62 = vsel %vm694_vm3, %v965_v60, 0 }
 0x4c4   : > { %2286 = vmatpush3.bf16.msra.mxu0 %v870_v52 }
 0x4c5   : > { %v2599_v53 = vpop.eup %2598  ;;  %2297 = vmatprep.subr.bf16.mxu0 %v3078_v2 }
 0x4c6   : > { %v809_v55 = vmul.f32 %v2599_v53, %v2595_v42  ;;  %v913_v63 = vpop.permute.xlu0 %912  ;;  %v963_v0 = vpop.permute.xlu1 %962 }
 0x4c8   : > { %v811_v56 = vpack.c.bf16 %v809_v55, %v809_v55 }
 0x4c9   : > { %v2601_v57 = vpop.eup %2600 }
 0x4ca   : > { %v810_v59 = vmul.f32 %v2601_v57, %v2597_v44  ;;  %2282 = vmatmul.mubr.msk.bf16.vlgmr.msra.gmra.mrb[4].mxu1 %vm694_vm3, %v811_v56 }
 0x4cb   : > { %2292 = vmatpush3.bf16.xpose.msra.mxu1 %v920_v58  ;;  %2293 = vmatprep.mubr.msk.bf16.mxu1 %vm3079_vm1, %v3078_v2 }
 0x4cc   : > { %v812_v61 = vpack.c.bf16 %v810_v59, %v810_v59  ;;  %2303 = vmatprep.subr.bf16.mxu1 %v3078_v2 }
 0x4ce   : > { %2288 = vmatmul.mubr.msk.bf16.vlgmr.msra.gmra.mrb[8].mxu0 %vm694_vm3, %v812_v61 }
 0x4cf   : > { %2298 = vmatpush3.bf16.xpose.msra.mxu0 %v970_v62  ;;  %2299 = vmatprep.mubr.msk.bf16.mxu0 %vm3079_vm1, %v3078_v2 }
 0x4d0   : > { %2309 = vmatprep.subr.bf16.mxu0 %v3078_v2 }
 0x4d2   : > { %2294 = vmatmul.mubr.msk.bf16.vlgmr.msra.gmra.mrb[8].mxu1 %vm694_vm3, %v913_v63 }
 0x4d3   : > { %2305 = vmatprep.mubr.msk.bf16.mxu1 %vm3079_vm1, %v3078_v2 }
 0x4d6   : > { %2300 = vmatmul.mubr.msk.bf16.vlgmr.msra.gmra.mrb[12].mxu0 %vm694_vm3, %v963_v0 }
 0x4d7   : > { %2311 = vmatprep.mubr.msk.bf16.mxu0 %vm3079_vm1, %v3078_v2 }
 0x59d   : > { %v3574_v1 = vpop.f32.mrb[4].mxu1 }
 0x59e   : > { %v2283_v3 = vpop.f32.mrb[5].mxu1 }
 0x59f   : > { %v860_v6 = vpop.f32.mrb[6].mxu1 }
 0x5a0   : > { %v2284_v7 = vpop.f32.mrb[7].mxu1 }
 0x5a1   : > { %v3576_v8 = vpop.f32.mrb[8].mxu0 }
 0x5a2   : > { %v2289_v9 = vpop.f32.mrb[9].mxu0 }
 0x5a3   : > { %v909_v11 = vpop.f32.mrb[10].mxu0 }
 0x5a4   : > { %v2290_v12 = vpop.f32.mrb[11].mxu0 }
 0x5a5   : > { %v956_v13 = vpop.f32.mrb[8].mxu1 }
 0x5a6   : > { %v2295_v15 = vpop.f32.mrb[9].mxu1  ;;  %v1012_v16 = vsel %vm694_vm3, %v956_v13, -inf }
 0x5a7   : > { %1013 = vmax.xlane.f32.xlu0 %v1012_v16  ;;  %v959_v17 = vpop.f32.mrb[10].mxu1 }
 0x5a8   : > { %v2296_v18 = vpop.f32.mrb[11].mxu1 }
 0x5a9   : > { %v1006_v19 = vpop.f32.mrb[12].mxu0 }
 0x5aa   : > { %v2301_v20 = vpop.f32.mrb[13].mxu0  ;;  %v1015_v21 = vsel %vm694_vm3, %v1006_v19, -inf }
 0x5ab   : > { %1016 = vmax.xlane.f32.xlu1 %v1015_v21  ;;  %v1009_v23 = vpop.f32.mrb[14].mxu0 }
 0x5ac   : > { %v2302_v24 = vpop.f32.mrb[15].mxu0 }
 0x5bc   : > { %1036 = vrot.lane.b32.xlu1 %v3538_v22, %s3085_s0 }
 0x5c0   : > { %1134 = vrot.lane.b32.xlu1 %v3520_v10, %s3086_s1 }
 0x5c4   : > { %1184 = vrot.lane.b32.xlu1 %v3523_v14, %s3086_s1 }
 0x5c8   : > { %1182 = vrot.lane.b32.xlu1 %v3523_v14, %s3087_s20 }
 0x634   : > { %v1014_v25 = vpop.xlane.xlu0 %1013 }
 0x635   : > { %v1018_v26 = vsub.f32 %v956_v13, %v1014_v25 }
 0x637   : > { %v1020_v27 = vmul.f32 1.442695, %v1018_v26 }
 0x638   : > { %v1017_v28 = vpop.xlane.xlu1 %1016 }
 0x639   : > { %2602 = vpow2.f32 %v1020_v27  ;;  %v1019_v29 = vsub.f32 %v1006_v19, %v1017_v28 }
 0x63b   : > { %v1022_v30 = vmul.f32 1.442695, %v1019_v29 }
 0x63c   : > { %v1037_v31 = vpop.permute.xlu1 %1036 }
 0x63d   : > { %2604 = vpow2.f32 %v1022_v30  ;;  %v1042_v32 = vsel %vm819_vm4, %v1037_v31, 0 }
 0x63e   : > { %2304 = vmatpush3.bf16.msra.mxu1 %v1042_v32 }
 0x63f   : > { %2315 = vmatprep.subr.bf16.mxu1 %v3078_v2 }
 0x640   : > { %v1135_v42 = vpop.permute.xlu1 %1134 }
 0x641   : > { %v1140_v46 = vsel %vm694_vm3, %v1135_v42, 0 }
 0x643   : > { %v2603_v33 = vpop.eup %2602 }
 0x644   : > { %v1024_v34 = vsel %vm694_vm3, %v2603_v33, 0.0  ;;  %v1185_v49 = vpop.permute.xlu1 %1184 }
 0x645   : > { %1025 = vadd.xlane.f32.xlu0 %v1024_v34  ;;  %v1190_v51 = vsel %vm694_vm3, %v1185_v49, 0 }
 0x647   : > { %v2605_v35 = vpop.eup %2604 }
 0x648   : > { %v1027_v36 = vsel %vm694_vm3, %v2605_v35, 0.0  ;;  %v1183_v53 = vpop.permute.xlu1 %1182 }
 0x649   : > { %1028 = vadd.xlane.f32.xlu0 %v1027_v36 }
 0x65f   : > { %1084 = vrot.lane.b32.xlu0 %v3548_v48, %s3085_s0  ;;  %s3095_s0 = smov [#allocation22]  }
 0x660   : > { %s1949_s1 = sshll.u32 %s3095_s0, 4  ;;  %s1950_s1 = int_to_ptr.vmem [resolvable:$true] %s1949_s1 }
 0x661   : > { %p2985_p11 = scmp.lt.s32.totalorder %s1950_s1, %s1950_s1 }
 0x663   : > { %1132 = vrot.lane.b32.xlu0 %v3520_v10, %s3087_s20  ;;  %s3801_s20 = sadd.s32 4294967295, %s3800_s15  }
 0x664   : > { %p3705_p6 = scmp.eq.s32.totalorder %s3801_s20, 1 }
 0x6d2   : > { %v1026_v37 = vpop.xlane.xlu0 %1025 }
 0x6d3   : > { %2606 = vrcp.f32 %v1026_v37 }
 0x6d6   : > { %v1029_v38 = vpop.xlane.xlu0 %1028 }
 0x6d7   : > { %2608 = vrcp.f32 %v1029_v38 }
 0x6da   : > { %v1085_v39 = vpop.permute.xlu0 %1084 }
 0x6db   : > { %v1090_v40 = vsel %vm819_vm4, %v1085_v39, 0 }
 0x6dc   : > { %2310 = vmatpush3.bf16.msra.mxu0 %v1090_v40 }
 0x6dd   : > { %v2607_v41 = vpop.eup %2606  ;;  %2321 = vmatprep.subr.bf16.mxu0 %v3078_v2 }
 0x6de   : > { %v1032_v43 = vmul.f32 %v2607_v41, %v2603_v33  ;;  %v1133_v52 = vpop.permute.xlu0 %1132 }
 0x6e0   : > { %v1034_v44 = vpack.c.bf16 %v1032_v43, %v1032_v43 }
 0x6e1   : > { %v2609_v45 = vpop.eup %2608 }
 0x6e2   : > { %v1033_v47 = vmul.f32 %v2609_v45, %v2605_v35  ;;  %2306 = vmatmul.mubr.msk.bf16.vlgmr.msra.gmra.mrb[12].mxu1 %vm694_vm3, %v1034_v44 }
 0x6e3   : > { %2316 = vmatpush3.bf16.xpose.msra.mxu1 %v1140_v46  ;;  %2317 = vmatprep.mubr.msk.bf16.mxu1 %vm3079_vm1, %v3078_v2 }
 0x6e4   : > { %v1035_v50 = vpack.c.bf16 %v1033_v47, %v1033_v47  ;;  %2327 = vmatprep.subr.bf16.mxu1 %v3078_v2 }
 0x6e6   : > { %2312 = vmatmul.mubr.msk.bf16.vlgmr.msra.gmra.mrb[16].mxu0 %vm694_vm3, %v1035_v50 }
 0x6e7   : > { %2322 = vmatpush3.bf16.xpose.msra.mxu0 %v1190_v51  ;;  %2323 = vmatprep.mubr.msk.bf16.mxu0 %vm3079_vm1, %v3078_v2 }
 0x6e8   : > { %2333 = vmatprep.subr.bf16.mxu0 %v3078_v2 }
 0x6ea   : > { %2318 = vmatmul.mubr.msk.bf16.vlgmr.msra.gmra.mrb[16].mxu1 %vm694_vm3, %v1133_v52 }
 0x6eb   : > { %2329 = vmatprep.mubr.msk.bf16.mxu1 %vm3079_vm1, %v3078_v2 }
 0x6ee   : > { %2324 = vmatmul.mubr.msk.bf16.vlgmr.msra.gmra.mrb[20].mxu0 %vm694_vm3, %v1183_v53 }
 0x6ef   : > { %2335 = vmatprep.mubr.msk.bf16.mxu0 %vm3079_vm1, %v3078_v2 }
 0x7b5   : > { %v3608_v54 = vpop.f32.mrb[12].mxu1 }
 0x7b6   : > { %v2307_v55 = vpop.f32.mrb[13].mxu1 }
 0x7b7   : > { %v1081_v56 = vpop.f32.mrb[14].mxu1 }
 0x7b8   : > { %v2308_v57 = vpop.f32.mrb[15].mxu1 }
 0x7b9   : > { %v3610_v58 = vpop.f32.mrb[16].mxu0 }
 0x7ba   : > { %v2569_v59 = vpack.i.bf16 %v3610_v58, %v3608_v54  ;;  %v2313_v60 = vpop.f32.mrb[17].mxu0 }
 0x7bb   : > { %v1129_v61 = vpop.f32.mrb[18].mxu0 }
 0x7bc   : > { %v2314_v62 = vpop.f32.mrb[19].mxu0 }
 0x7bd   : > { %v1176_v63 = vpop.f32.mrb[16].mxu1 }
 0x7be   : > { %v2319_v0 = vpop.f32.mrb[17].mxu1  ;;  %v1232_v3 = vsel %vm694_vm3, %v1176_v63, -inf }
 0x7bf   : > { %1233 = vmax.xlane.f32.xlu0 %v1232_v3  ;;  %v1179_v6 = vpop.f32.mrb[18].mxu1 }
 0x7c0   : > { %v2320_v7 = vpop.f32.mrb[19].mxu1 }
 0x7c1   : > { %v1226_v9 = vpop.f32.mrb[20].mxu0 }
 0x7c2   : > { %v2325_v11 = vpop.f32.mrb[21].mxu0  ;;  %v1235_v12 = vsel %vm694_vm3, %v1226_v9, -inf }
 0x7c3   : > { %1236 = vmax.xlane.f32.xlu1 %v1235_v12  ;;  %v1229_v13 = vpop.f32.mrb[22].mxu0 }
 0x7c4   : > { %v2326_v15 = vpop.f32.mrb[23].mxu0 }
 0x7d4   : > { %1256 = vrot.lane.b32.xlu1 %v3538_v22, %s3088_s13 }
 0x7d8   : > { %1354 = vrot.lane.b32.xlu1 %v3520_v10, %s3089_s14 }
 0x7dc   : > { %1404 = vrot.lane.b32.xlu1 %v3523_v14, %s3089_s14 }
 0x7e0   : > { %1402 = vrot.lane.b32.xlu1 %v3523_v14, %s3090_s18 }
 0x84c   : > { %v1234_v16 = vpop.xlane.xlu0 %1233 }
 0x84d   : > { %v1238_v17 = vsub.f32 %v1176_v63, %v1234_v16 }
 0x84f   : > { %v1240_v18 = vmul.f32 1.442695, %v1238_v17 }
 0x850   : > { %v1237_v19 = vpop.xlane.xlu1 %1236 }
 0x851   : > { %2610 = vpow2.f32 %v1240_v18  ;;  %v1239_v20 = vsub.f32 %v1226_v9, %v1237_v19 }
 0x853   : > { %v1242_v21 = vmul.f32 1.442695, %v1239_v20 }
 0x854   : > { %v1257_v23 = vpop.permute.xlu1 %1256 }
 0x855   : > { %2612 = vpow2.f32 %v1242_v21  ;;  %v1262_v24 = vsel %vm819_vm4, %v1257_v23, 0 }
 0x856   : > { %2328 = vmatpush3.bf16.msra.mxu1 %v1262_v24 }
 0x857   : > { %2339 = vmatprep.subr.bf16.mxu1 %v3078_v2 }
 0x858   : > { %v1355_v33 = vpop.permute.xlu1 %1354 }
 0x859   : > { %v1360_v37 = vsel %vm694_vm3, %v1355_v33, 0 }
 0x85b   : > { %v2611_v25 = vpop.eup %2610 }
 0x85c   : > { %v1244_v26 = vsel %vm694_vm3, %v2611_v25, 0.0 }
 0x85d   : > { %1245 = vadd.xlane.f32.xlu0 %v1244_v26 }
 0x85f   : > { %v2613_v27 = vpop.eup %2612 }
 0x860   : > { %v1247_v14 = vsel %vm694_vm3, %v2613_v27, 0.0 }
 0x861   : > { %1248 = vadd.xlane.f32.xlu0 %v1247_v14  ;;  %v2587_v14 = vld [vmem:[%s1606_s21 + $0x8] sm:$0xff]  }
 0x877   : > { %1304 = vrot.lane.b32.xlu0 %v3548_v48, %s3088_s13 }
 0x87b   : > { %1352 = vrot.lane.b32.xlu0 %v3520_v10, %s3090_s18  ;;  %v1405_v10 = vpop.permute.xlu1 %1404 }
 0x87c   : > { %v1410_v40 = vsel %vm694_vm3, %v1405_v10, 0 }
 0x87f   : > { %v1403_v42 = vpop.permute.xlu1 %1402 }
 0x8ea   : > { %v1246_v28 = vpop.xlane.xlu0 %1245 }
 0x8eb   : > { %2614 = vrcp.f32 %v1246_v28 }
 0x8ee   : > { %v1249_v29 = vpop.xlane.xlu0 %1248 }
 0x8ef   : > { %2616 = vrcp.f32 %v1249_v29 }
 0x8f2   : > { %v1305_v30 = vpop.permute.xlu0 %1304 }
 0x8f3   : > { %v1310_v31 = vsel %vm819_vm4, %v1305_v30, 0 }
 0x8f4   : > { %2334 = vmatpush3.bf16.msra.mxu0 %v1310_v31 }
 0x8f5   : > { %v2615_v32 = vpop.eup %2614  ;;  %2345 = vmatprep.subr.bf16.mxu0 %v3078_v2 }
 0x8f6   : > { %v1252_v34 = vmul.f32 %v2615_v32, %v2611_v25  ;;  %v1353_v41 = vpop.permute.xlu0 %1352 }
 0x8f8   : > { %v1254_v35 = vpack.c.bf16 %v1252_v34, %v1252_v34 }
 0x8f9   : > { %v2617_v36 = vpop.eup %2616 }
 0x8fa   : > { %v1253_v38 = vmul.f32 %v2617_v36, %v2613_v27  ;;  %2330 = vmatmul.mubr.msk.bf16.vlgmr.msra.gmra.mrb[20].mxu1 %vm694_vm3, %v1254_v35  ;;  %v2586_v27 = vld [vmem:[%s1606_s21] sm:$0xff]   ;;  %s1804_s21 = scalar_lea.vmem [#allocation16], %s2212_s16 }
 0x8fb   : > { %2340 = vmatpush3.bf16.xpose.msra.mxu1 %v1360_v37  ;;  %2341 = vmatprep.mubr.msk.bf16.mxu1 %vm3079_vm1, %v3078_v2 }
 0x8fc   : > { %v1255_v39 = vpack.c.bf16 %v1253_v38, %v1253_v38  ;;  %2351 = vmatprep.subr.bf16.mxu1 %v3078_v2 }
 0x8fe   : > { %2336 = vmatmul.mubr.msk.bf16.vlgmr.msra.gmra.mrb[24].mxu0 %vm694_vm3, %v1255_v39 }
 0x8ff   : > { %2346 = vmatpush3.bf16.xpose.msra.mxu0 %v1410_v40  ;;  %2347 = vmatprep.mubr.msk.bf16.mxu0 %vm3079_vm1, %v3078_v2 }
 0x900   : > { %2357 = vmatprep.subr.bf16.mxu0 %v3078_v2 }
 0x902   : > { %2342 = vmatmul.mubr.msk.bf16.vlgmr.msra.gmra.mrb[24].mxu1 %vm694_vm3, %v1353_v41 }
 0x903   : > { %2353 = vmatprep.mubr.msk.bf16.mxu1 %vm3079_vm1, %v3078_v2 }
 0x906   : > { %2348 = vmatmul.mubr.msk.bf16.vlgmr.msra.gmra.mrb[28].mxu0 %vm694_vm3, %v1403_v42 }
 0x907   : > { %2359 = vmatprep.mubr.msk.bf16.mxu0 %vm3079_vm1, %v3078_v2 }
 0x9cd   : > { %v1298_v43 = vpop.f32.mrb[20].mxu1 }
 0x9ce   : > { %v2331_v44 = vpop.f32.mrb[21].mxu1 }
 0x9cf   : > { %v1301_v45 = vpop.f32.mrb[22].mxu1 }
 0x9d0   : > { %v2332_v46 = vpop.f32.mrb[23].mxu1 }
 0x9d1   : > { %v1346_v47 = vpop.f32.mrb[24].mxu0 }
 0x9d2   : > { %v2574_v49 = vpack.i.bf16 %v1346_v47, %v1298_v43  ;;  %v2337_v50 = vpop.f32.mrb[25].mxu0 }
 0x9d3   : > { %v1349_v51 = vpop.f32.mrb[26].mxu0 }
 0x9d4   : > { %v2338_v52 = vpop.f32.mrb[27].mxu0 }
 0x9d5   : > { %v1396_v53 = vpop.f32.mrb[24].mxu1 }
 0x9d6   : > { %v2343_v55 = vpop.f32.mrb[25].mxu1  ;;  %v1452_v56 = vsel %vm694_vm3, %v1396_v53, -inf }
 0x9d7   : > { %1453 = vmax.xlane.f32.xlu0 %v1452_v56  ;;  %v1399_v57 = vpop.f32.mrb[26].mxu1 }
 0x9d8   : > { %v2344_v60 = vpop.f32.mrb[27].mxu1 }
 0x9d9   : > { %v1446_v61 = vpop.f32.mrb[28].mxu0 }
 0x9da   : > { %v2349_v62 = vpop.f32.mrb[29].mxu0  ;;  %v1455_v63 = vsel %vm694_vm3, %v1446_v61, -inf }
 0x9db   : > { %1456 = vmax.xlane.f32.xlu1 %v1455_v63  ;;  %v1449_v0 = vpop.f32.mrb[30].mxu0 }
 0x9dc   : > { %v2350_v3 = vpop.f32.mrb[31].mxu0 }
 0x9ec   : > { %1476 = vrot.lane.b32.xlu1 %v3538_v22, %s3091_s17 }
 0x9f0   : > { %2570 = vrot.lane.b32.xlu1 %v2569_v59, %s3092_s2 }
 0x9f4   : > { %2575 = vrot.lane.b32.xlu1 %v2574_v49, %s3093_s12 }
 0xa64   : > { %v1454_v6 = vpop.xlane.xlu0 %1453 }
 0xa65   : > { %v1458_v7 = vsub.f32 %v1396_v53, %v1454_v6 }
 0xa67   : > { %v1460_v9 = vmul.f32 1.442695, %v1458_v7 }
 0xa68   : > { %v1457_v11 = vpop.xlane.xlu1 %1456 }
 0xa69   : > { %2618 = vpow2.f32 %v1460_v9  ;;  %v1459_v12 = vsub.f32 %v1446_v61, %v1457_v11 }
 0xa6b   : > { %v1462_v13 = vmul.f32 1.442695, %v1459_v12  ;;  %v2588_v12 = vld [vmem:[%s1718_s23] sm:$0xff]  }
 0xa6c   : > { %v1477_v15 = vpop.permute.xlu1 %1476 }
 0xa6d   : > { %2620 = vpow2.f32 %v1462_v13  ;;  %v1482_v16 = vsel %vm819_vm4, %v1477_v15, 0  ;;  %v2589_v13 = vld [vmem:[%s1718_s23 + $0x8] sm:$0xff]   ;;  %s1723_s23 = scalar_lea.vmem [#allocation14], %s3799_s29  ;;  %s2978_s29 = scalar_lea.vmem %s1950_s1, 256 }
 0xa6e   : > { %2352 = vmatpush3.bf16.msra.mxu1 %v1482_v16  ;;  %p2979_p8 = scmp.ne.s32.totalorder %s1950_s1, %s2978_s29  ;;  %p2986_p12 = scmp.lt.s32.totalorder %s2978_s29, %s2978_s29 }
 0xa6f   : > { %2363 = vmatprep.subr.bf16.mxu1 %v3078_v2 }
 0xa70   : > { %v2571_v37 = vpop.permute.xlu1 %2570  ;;  %p2980_p9 = pnand %p2979_p8, %p3705_p6  ;;  %p2987_p13 = por %p2986_p12, %p2985_p11 }
 0xa71   : > { %v2573_v10 = vunpack.i.h.bf16 %v2571_v37  ;;  %v2572_v39 = vunpack.i.l.bf16 %v2571_v37 }
 0xa72   : > { %p2981_p10 = pneg %p2980_p9 }
 0xa73   : > { %v2619_v22 = vpop.eup %2618  ;;  %v1597_v43 = vsel %vm694_vm3, %v3576_v8, %v2573_v10  ;;  %v1596_v44 = vsel %vm694_vm3, %v3574_v1, %v2572_v39 }
 0xa74   : > { %v1464_v54 = vsel %vm694_vm3, %v2619_v22, 0.0  ;;  %v2576_v38 = vpop.permute.xlu1 %2575  ;;  %p2988_p0 = pnand %p2987_p13, %p2981_p10 }
 0xa75   : > { %1465 = vadd.xlane.f32.xlu0 %v1464_v54  ;;  %v2578_v40 = vunpack.i.h.bf16 %v2576_v38  ;;  %v2577_v41 = vunpack.i.l.bf16 %v2576_v38 }
 0xa77   : > { %v2621_v58 = vpop.eup %2620  ;;  %v1599_v47 = vsel %vm1598_vm5, %v1596_v44, %v2577_v41  ;;  %v1600_v49 = vsel %vm1598_vm5, %v1597_v43, %v2578_v40 }
 0xa78   : > { %v1467_v59 = vsel %vm694_vm3, %v2621_v58, 0.0 }
 0xa79   : > { %1468 = vadd.xlane.f32.xlu0 %v1467_v59 }
 0xa8f   : > { %1524 = vrot.lane.b32.xlu0 %v3548_v48, %s3091_s17 }
 0xb02   : > { %v1466_v17 = vpop.xlane.xlu0 %1465 }
 0xb03   : > { %2622 = vrcp.f32 %v1466_v17 }
 0xb06   : > { %v1469_v18 = vpop.xlane.xlu0 %1468 }
 0xb07   : > { %2624 = vrcp.f32 %v1469_v18  ;;  %v2182_v18 = vld [vmem:[%s1669_s26] ss:$0 sm:$0xff] }
 0xb0a   : > { %v1525_v19 = vpop.permute.xlu0 %1524 }
 0xb0b   : > { %v1530_v20 = vsel %vm819_vm4, %v1525_v19, 0 }
 0xb0c   : > { %2358 = vmatpush3.bf16.msra.mxu0 %v1530_v20 }
 0xb0d   : > { %v2623_v21 = vpop.eup %2622  ;;  %2371 = vmatprep.subr.bf16.mxu0 %v3078_v2 }
 0xb0e   : > { %v1472_v23 = vmul.f32 %v2623_v21, %v2619_v22 }
 0xb10   : > { %v1474_v24 = vpack.c.bf16 %v1472_v23, %v1472_v23 }
 0xb11   : > { %v2625_v25 = vpop.eup %2624 }
 0xb12   : > { %v1473_v26 = vmul.f32 %v2625_v25, %v2621_v58  ;;  %2354 = vmatmul.mubr.msk.bf16.vlgmr.msra.gmra.mrb[28].mxu1 %vm694_vm3, %v1474_v24  ;;  %v2183_v24 = vld [vmem:[%s1671_s28] ss:$0 sm:$0xff] }
 0xb13   : > { %2367 = vmatprep.mubr.msk.bf16.mxu1 %vm3079_vm1, %v3078_v2  ;;  %2364 = vmatpush3.bf16.msra.mxu1 %v2586_v27 }
 0xb14   : > { %v1475_v48 = vpack.c.bf16 %v1473_v26, %v1473_v26  ;;  %2365 = vmatprep.subr.bf16.mxu1 %v3078_v2 }
 0xb16   : > { %2360 = vmatmul.mubr.msk.bf16.vlgmr.msra.gmra.mrb[32].mxu0 %vm694_vm3, %v1475_v48 }
 0xb17   : > { %2375 = vmatprep.mubr.msk.bf16.mxu0 %vm3079_vm1, %v3078_v2  ;;  %2366 = vmatpush3.bf16.msra.mxu1 %v2587_v14  ;;  %v2590_v14 = vld [vmem:[%s1804_s21] sm:$0xff]  }
 0xb18   : > { %2379 = vmatprep.subr.bf16.mxu1 %v3078_v2  ;;  %2372 = vmatpush3.bf16.msra.mxu0 %v2588_v12 }
 0xb19   : > { %2373 = vmatprep.subr.bf16.mxu0 %v3078_v2 }
 0xb1c   : > { %2374 = vmatpush3.bf16.msra.mxu0 %v2589_v13 }
 0xbe5   : > { %v1518_v28 = vpop.f32.mrb[28].mxu1 }
 0xbe6   : > { %v2355_v29 = vpop.f32.mrb[29].mxu1 }
 0xbe7   : > { %v1521_v30 = vpop.f32.mrb[30].mxu1  ;;  %v2592_v29 = vld [vmem:[%s1804_s21 + $0x10] sm:$0xff]  }
 0xbe8   : > { %v2356_v31 = vpop.f32.mrb[31].mxu1  ;;  %v2593_v30 = vld [vmem:[%s1804_s21 + $0x18] sm:$0xff]  }
 0xbe9   : > { %v1566_v32 = vpop.f32.mrb[32].mxu0  ;;  %v2185_v31 = vld [vmem:[%s1723_s23] ss:$0 sm:$0xff] }
 0xbea   : > { %v2579_v33 = vpack.i.bf16 %v1566_v32, %v1518_v28  ;;  %v2361_v34 = vpop.f32.mrb[33].mxu0  ;;  %v2591_v28 = vld [vmem:[%s1804_s21 + $0x8] sm:$0xff]  }
 0xbeb   : > { %v1569_v35 = vpop.f32.mrb[34].mxu0 }
 0xbec   : > { %2580 = vrot.lane.b32.xlu0 %v2579_v33, %s3094_s19  ;;  %v2362_v36 = vpop.f32.mrb[35].mxu0 }
 0xc5e   : > { %v2581_v42 = vpop.permute.xlu0 %2580 }
 0xc5f   : > { %v2583_v45 = vunpack.i.h.bf16 %v2581_v42  ;;  %v2582_v46 = vunpack.i.l.bf16 %v2581_v42 }
 0xc61   : > { %v1603_v50 = vsel %vm1601_vm6, %v1600_v49, %v2583_v45  ;;  %v1602_v51 = vsel %vm1601_vm6, %v1599_v47, %v2582_v46  ;;  %v2193_v47 = vld [vmem:[%s1813_s24] ss:$0 sm:$0xff] }
 0xc62   : > { %v1604_v52 = vpack.c.bf16 %v1603_v50, %v1602_v51 }
 0xc64   : > { %2368 = vmatmul.mubr.msk.bf16.vlgmr.msra.gmra.mrb[32].mxu1 %vm625_vm2, %v1604_v52 }
 0xc65   : > { %2387 = vmatprep.mubr.msk.bf16.mxu1 %vm3079_vm1, %v3078_v2  ;;  %2380 = vmatpush3.bf16.msra.mxu1 %v2590_v14 }
 0xc66   : > { %2381 = vmatprep.subr.bf16.mxu1 %v3078_v2 }
 0xc69   : > { %2382 = vmatpush3.bf16.msra.mxu1 %v2591_v28 }
 0xc6a   : > { %2383 = vmatprep.subr.bf16.mxu1 %v3078_v2 }
 0xc6d   : > { %2384 = vmatpush3.bf16.msra.mxu1 %v2592_v29 }
 0xc6e   : > { %2385 = vmatprep.subr.bf16.mxu1 %v3078_v2 }
 0xc71   : > { %2386 = vmatpush3.bf16.msra.mxu1 %v2593_v30 }
 0xd37   : > { %v1660_v53 = vpop.f32.mrb[32].mxu1 }
 0xd38   : > { %v1667_v55 = vadd.f32 %v1660_v53, %v3504_v4  ;;  %v2369_v56 = vpop.f32.mrb[33].mxu1 }
 0xd39   : > { %v1663_v8 = vpop.f32.mrb[34].mxu1 }
 0xd3a   : > { %v1668_v57 = vadd.f32 %v1663_v8, %v3506_v5  ;;  %v2370_v1 = vpop.f32.mrb[35].mxu1  ;;  %v1673_v60 = vsel %vm625_vm2, %v1667_v55, 0.0 }
 0xd3b   : > { %1674 = vadd.xlane.f32.xlu1 %v1673_v60 }
 0xd3c   : > { %v1676_v61 = vsel %vm625_vm2, %v1668_v57, 0.0 }
 0xd3d   : > { %1677 = vadd.xlane.f32.xlu0 %v1676_v61 }
 0xdc8   : > { %v1675_v62 = vpop.xlane.xlu1 %1674 }
 0xdc9   : > { %v1680_v63 = vmul.f32 0.03125, %v1675_v62 }
 0xdca   : > { %v1678_v0 = vpop.xlane.xlu0 %1677 }
 0xdcb   : > { %v1682_v3 = vsub.f32 %v1667_v55, %v1680_v63  ;;  %v1681_v6 = vmul.f32 0.03125, %v1678_v0 }
 0xdcd   : > { %v1683_v7 = vsub.f32 %v1668_v57, %v1681_v6  ;;  %v1684_v4 = vmul.f32 %v1682_v3, %v1682_v3 }
 0xdcf   : > { %v1686_v9 = vsel %vm625_vm2, %v1684_v4, 0.0  ;;  %v1685_v11 = vmul.f32 %v1683_v7, %v1683_v7 }
 0xdd0   : > { %1687 = vadd.xlane.f32.xlu0 %v1686_v9 }
 0xdd1   : > { %v1689_v5 = vsel %vm625_vm2, %v1685_v11, 0.0 }
 0xdd2   : > { %1690 = vadd.xlane.f32.xlu1 %v1689_v5 }
 0xe5d   : > { %v1688_v15 = vpop.xlane.xlu0 %1687 }
 0xe5e   : > { %v1692_v16 = vmul.f32 0.03125, %v1688_v15 }
 0xe5f   : > { %v1691_v22 = vpop.xlane.xlu1 %1690 }
 0xe60   : > { %v1694_v54 = vadd.f32 1e-05, %v1692_v16  ;;  %v1693_v58 = vmul.f32 0.03125, %v1691_v22 }
 0xe62   : > { %2626 = vrsqrt.f32 %v1694_v54  ;;  %v1695_v59 = vadd.f32 1e-05, %v1693_v58  ;;  %v2199_v54 = vld [vmem:[%s1892_s30] ss:$0 sm:$0xff] }
 0xe64   : > { %2628 = vrsqrt.f32 %v1695_v59 }
 0xe6c   : > { %v2627_v17 = vpop.eup %2626 }
 0xe6d   : > { %v1698_v19 = vmul.f32 %v2627_v17, %v1682_v3  ;;  %v2200_v17 = vld [vmem:[%s1894_s27] ss:$0 sm:$0xff] }
 0xe6e   : > { %v2629_v20 = vpop.eup %2628 }
 0xe6f   : > { %v1706_v21 = vmul.f32 %v2182_v18, %v1698_v19  ;;  %v1699_v23 = vmul.f32 %v2629_v20, %v1683_v7 }
 0xe71   : > { %v1707_v25 = vmul.f32 %v2182_v18, %v1699_v23  ;;  %v1714_v26 = vadd.f32 %v2183_v24, %v1706_v21 }
 0xe73   : > { %v1715_v48 = vadd.f32 %v2183_v24, %v1707_v25 }
 0xe75   : > { %v1716_v27 = vpack.c.bf16 %v1715_v48, %v1714_v26 }
 0xe77   : > { %2376 = vmatmul.mubr.msk.bf16.vlgmr.msra.gmra.mrb[36].mxu0 %vm625_vm2, %v1716_v27 }
 0xf4a   : > { %v1780_v32 = vpop.f32.mrb[36].mxu0 }
 0xf4b   : > { %v1781_v33 = vadd.f32 %v2185_v31, %v1780_v32  ;;  %v2377_v34 = vpop.f32.mrb[37].mxu0 }
 0xf4c   : > { %v1783_v35 = vpop.f32.mrb[38].mxu0 }
 0xf4d   : > { %v2189_v36 = vmul.f32 -1.442695, %v1781_v33  ;;  %v1784_v37 = vadd.f32 %v2185_v31, %v1783_v35  ;;  %v2378_v38 = vpop.f32.mrb[39].mxu0 }
 0xf4f   : > { %2630 = vpow2.f32 %v2189_v36  ;;  %v2190_v10 = vmul.f32 -1.442695, %v1784_v37 }
 0xf51   : > { %2632 = vpow2.f32 %v2190_v10 }
 0xf59   : > { %v2631_v39 = vpop.eup %2630 }
 0xf5a   : > { %v1793_v40 = vadd.f32 1.0, %v2631_v39 }
 0xf5b   : > { %v2633_v41 = vpop.eup %2632 }
 0xf5c   : > { %2634 = vrcp.f32 %v1793_v40  ;;  %v1794_v2 = vadd.f32 1.0, %v2633_v41 }
 0xf5e   : > { %2636 = vrcp.f32 %v1794_v2 }
 0xf66   : > { %v2635_v42 = vpop.eup %2634 }
 0xf67   : > { %v1799_v44 = vmul.f32 %v2635_v42, %v1781_v33 }
 0xf68   : > { %v2637_v43 = vpop.eup %2636 }
 0xf69   : > { %v1800_v45 = vmul.f32 %v2637_v43, %v1784_v37 }
 0xf6b   : > { %v1801_v46 = vpack.c.bf16 %v1800_v45, %v1799_v44 }
 0xf6d   : > { %2388 = vmatmul.mubr.msk.bf16.vlgmr.msra.gmra.mrb[36].mxu1 %vm1845_vm7, %v1801_v46 }
0x1040   : > { %v1883_v49 = vpop.f32.mrb[36].mxu1 }
0x1041   : > { %v1884_v50 = vadd.f32 %v2193_v47, %v1883_v49  ;;  %v2389_v51 = vpop.f32.mrb[37].mxu1 }
0x1042   : > { %v1886_v52 = vpop.f32.mrb[38].mxu1 }
0x1043   : > { %v1887_v53 = vadd.f32 %v2193_v47, %v1886_v52  ;;  %v2390_v55 = vpop.f32.mrb[39].mxu1  ;;  %v1890_v56 = vadd.f32 %v1884_v50, %v1714_v26 }
0x1045   : > { %v1896_v8 = vsel %vm625_vm2, %v1890_v56, 0.0  ;;  %v1891_v57 = vadd.f32 %v1887_v53, %v1715_v48 }
0x1046   : > { %1897 = vadd.xlane.f32.xlu0 %v1896_v8 }
0x1047   : > { %v1899_v1 = vsel %vm625_vm2, %v1891_v57, 0.0 }
0x1048   : > { %1900 = vadd.xlane.f32.xlu1 %v1899_v1 }
0x10d3   : > { %v1898_v60 = vpop.xlane.xlu0 %1897 }
0x10d4   : > { %v1902_v61 = vmul.f32 0.03125, %v1898_v60 }
0x10d5   : > { %v1901_v62 = vpop.xlane.xlu1 %1900 }
0x10d6   : > { %v1904_v63 = vsub.f32 %v1890_v56, %v1902_v61  ;;  %v1903_v0 = vmul.f32 0.03125, %v1901_v62 }
0x10d8   : > { %v1905_v3 = vsub.f32 %v1891_v57, %v1903_v0  ;;  %v1906_v6 = vmul.f32 %v1904_v63, %v1904_v63 }
0x10da   : > { %v1908_v7 = vsel %vm625_vm2, %v1906_v6, 0.0  ;;  %v1907_v4 = vmul.f32 %v1905_v3, %v1905_v3 }
0x10db   : > { %1909 = vadd.xlane.f32.xlu0 %v1908_v7 }
0x10dc   : > { %v1911_v9 = vsel %vm625_vm2, %v1907_v4, 0.0 }
0x10dd   : > { %1912 = vadd.xlane.f32.xlu1 %v1911_v9 }
0x1168   : > { %v1910_v11 = vpop.xlane.xlu0 %1909 }
0x1169   : > { %v1914_v5 = vmul.f32 0.03125, %v1910_v11 }
0x116a   : > { %v1913_v12 = vpop.xlane.xlu1 %1912 }
0x116b   : > { %v1916_v13 = vadd.f32 1e-05, %v1914_v5  ;;  %v1915_v15 = vmul.f32 0.03125, %v1913_v12 }
0x116d   : > { %2638 = vrsqrt.f32 %v1916_v13  ;;  %v1917_v16 = vadd.f32 1e-05, %v1915_v15 }
0x116f   : > { %2640 = vrsqrt.f32 %v1917_v16 }
0x1177   : > { %v2639_v22 = vpop.eup %2638 }
0x1178   : > { %v1920_v58 = vmul.f32 %v2639_v22, %v1904_v63 }
0x1179   : > { %v2641_v59 = vpop.eup %2640 }
0x117a   : > { %v1928_v18 = vmul.f32 %v2199_v54, %v1920_v58  ;;  %v1921_v19 = vmul.f32 %v2641_v59, %v1905_v3 }
0x117c   : > { %v1929_v20 = vmul.f32 %v2199_v54, %v1921_v19  ;;  %v1936_v21 = vadd.f32 %v2200_v17, %v1928_v18 }
0x117e   : > { %v1937_v23 = vadd.f32 %v2200_v17, %v1929_v20  ;;  %1938 = vst.msk [vmem:[#allocation22] sm:$0xff] %vm625_vm2, %v1936_v21 }
0x1180   : > { %1939 = vst.msk [vmem:[#allocation22 + $0x8] sm:$0xff] %vm625_vm2, %v1937_v23 }
0x1181   : > { %2991 = shalt.err (!%p2988_p0)
}
0x1182   : > { %s3803_s17 = sld [smem:[#allocation37_spill]] }
0x1188   : > { %s2992_s12 = scalar_lea.hbm %s3803_s17, 256 }
0x1189   : > { %p2993_p1 = scmp.ne.s32.totalorder %s3803_s17, %s2992_s12  ;;  %p2998_p3 = scmp.lt.u32.totalorder %s2992_s12, %s3803_s17 }
0x118b   : > { %p2994_p4 = pnand %p2993_p1, %p3705_p6 }
0x118d   : > { %p2995_p2 = pneg %p2994_p4 }
0x118f   : > { %p3000_p7 = pnand %p2998_p3, %p2995_p2 }
0x1191   : > { %3003 = shalt.err (!%p3000_p7)
}
0x1192   : > { %s3096_s21 = smov 128  }
0x1193   : > { %2440 = dma.vmem_to_hbm [thread:$0]  (%p3705_p6), %s1950_s1, 256, %s3803_s17, [#allocation4], %s3096_s21, %s3096_s21, %s3092_s2  }
0x1194   : > { %3045 = dma.done.wait (%p3705_p6), [#allocation4], 256  }
0x1195   : > { %3047 = vsyncadd (%p3705_p6), [#allocation4], 4294967040 }
0x1196 PF: > { %s3804_s15 = sld [smem:[#allocation32_spill]]  ;;  %s3805_s21 = smov %s3054_s22 }
0x1197   : > { %s3806_s22 = smov %s3808_s25 }
0x119c   : > { %s30_s23 = sadd.s32 1, %s3804_s15  }
0x119d   : > { %p27_p5 = scmp.ge.s32.totalorder %s30_s23, 4  }
0x119f   :  { %29 = sbr.rel (!%p27_p5) target bundleno = 14 (0xe), region = 158 }
0x11a6   :  { %1965 = vsyncpa [#allocation3], 1 }
0x11a7   :  { %1967 = vsyncpa [#allocation3 + $0x1], 1 }
0x11a8   :  { %1968 = vsyncpa [#allocation6], 1 }
0x11a9   :  { %1969 = vsyncpa [#allocation9], 1 }
0x11aa   :  { %1970 = vsyncpa [#allocation12], 1 }
0x11ab   :  { %1971 = vsyncpa [#allocation15], 1 }
0x11ac   :  { %1972 = vsyncpa [#allocation18], 1 }
0x11ad   :  { %1973 = vsyncpa [#allocation21], 1 }
0x11ae   :  { %1974 = vsyncpa [#allocation4], 1 }
0x11af   :  { %1976 = vsyncpa [#allocation4 + $0x1], 1 }

</bundles_post_ra>
